<compile_context>
chip_gen: v5e
topology: v5e:2x2
jax: 0.10.0
libtpu: 0.0.40
codegen_flags: <defaults>
</compile_context>

<pallas_src>
import math
from functools import partial

import jax
import jax.numpy as jnp
from jax.experimental import pallas as pl
from jax.experimental.pallas import tpu as pltpu


def _layer_norm(x, w, b, eps=1e-5):
    mu = jnp.mean(x, axis=-1, keepdims=True)
    var = jnp.mean((x - mu) ** 2, axis=-1, keepdims=True)
    return (x - mu) * jax.lax.rsqrt(var + eps) * w + b


def _layer_kernel(num_heads, group_size, activation, mm_dtype,
                  x_ref, pe_ref,
                  wqk_ref, bqk_ref, wv_ref, bv_ref, wo_ref, bo_ref,
                  w1_ref, b1_ref, w2_ref, b2_ref, ln_ref,
                  out_ref):
    x = x_ref[...].astype(jnp.float32)       # (M, C), M = Bg * group_size
    pe = pe_ref[...].astype(jnp.float32)     # (M, C)
    M, C = x.shape
    G = group_size
    Bg = M // G
    H = num_heads
    hd = C // H
    scale = 1.0 / math.sqrt(hd)

    # ---- GroupAttention: q = k = x + pe, v = x (torch MultiheadAttention) ----
    # Fused Q/K projection: one (M, C) @ (C, 2C) GEMM; V uses x (not x + pe).
    qk_in = (x + pe).astype(mm_dtype)
    qk = jnp.dot(qk_in, wqk_ref[...], preferred_element_type=jnp.float32) + bqk_ref[...]
    v = jnp.dot(x.astype(mm_dtype), wv_ref[...],
                preferred_element_type=jnp.float32) + bv_ref[...]
    q = qk[:, :C] * scale
    k = qk[:, C:]

    # Batch over groups: (M, C) -> (Bg, G, C); leading-dim-only reshape (cheap).
    q3 = q.reshape(Bg, G, C)
    k3 = k.reshape(Bg, G, C)
    v3 = v.reshape(Bg, G, C)

    head_outs = []
    for h in range(H):   # static unroll over heads; each op is batched over Bg groups
        sl = slice(h * hd, (h + 1) * hd)
        qh = q3[..., sl].astype(mm_dtype)
        kh = k3[..., sl].astype(mm_dtype)
        vh = v3[..., sl].astype(mm_dtype)
        s = jnp.einsum('bqd,bkd->bqk', qh, kh,
                       preferred_element_type=jnp.float32)           # (Bg, G, G)
        s = s - jnp.max(s, axis=-1, keepdims=True)
        p = jnp.exp(s)
        p = p * pl.reciprocal(jnp.sum(p, axis=-1, keepdims=True), approx=True)
        head_outs.append(jnp.einsum('bqk,bkd->bqd', p.astype(mm_dtype), vh,
                                    preferred_element_type=jnp.float32))
    attn = jnp.concatenate(head_outs, axis=-1).reshape(M, C)
    attn = jnp.dot(attn.astype(mm_dtype), wo_ref[...],
                   preferred_element_type=jnp.float32) + bo_ref[...]

    ln = ln_ref[...].astype(jnp.float32)      # (4, C): n1w, n1b, n2w, n2b

    # ---- residual + norm1 (f32) ----
    h1 = _layer_norm(x + attn, ln[0:1], ln[1:2])

    # ---- FFN: fc1 -> act -> fc2 ----
    ff = jnp.dot(h1.astype(mm_dtype), w1_ref[...],
                 preferred_element_type=jnp.float32) + b1_ref[...]
    if activation == 'relu':
        ff = jnp.maximum(ff, 0.0)
    else:
        # exact erf form to match torch.nn.functional.gelu (not tanh approx)
        ff = jax.nn.gelu(ff, approximate=False)
        # TODO(synk): torch 'glu' activation not implemented (would change fc2 width).
    ff = jnp.dot(ff.astype(mm_dtype), w2_ref[...],
                 preferred_element_type=jnp.float32) + b2_ref[...]

    # ---- residual + norm2 (f32) ----
    out = _layer_norm(h1 + ff, ln[2:3], ln[3:4])
    out_ref[...] = out.astype(out_ref.dtype)


def _choose_group_batch(num_groups, group_size, target_tokens=2048):
    """Pick groups-per-block: as many groups as fit `target_tokens` rows,
    dividing num_groups evenly, and (when possible) leaving >= 2 grid steps so
    both TensorCores on v7x get work."""
    cap = max(1, target_tokens // group_size)
    divisors = [d for d in range(1, num_groups + 1)
                if num_groups % d == 0 and d <= cap]
    multi = [d for d in divisors if num_groups // d >= 2]
    return max(multi) if multi else max(divisors)


def basic_layer_apply(x_win, pe_win, layer_params, *, num_heads, group_size,
                      activation='relu', mm_dtype=jnp.bfloat16,
                      target_tokens_per_block=2048):
    """Run one BasicLayer over windowed tokens (N_win, C) with a Pallas kernel."""
    N, C = x_win.shape
    assert N % group_size == 0
    num_groups = N // group_size
    bg = _choose_group_batch(num_groups, group_size, target_tokens_per_block)
    block_rows = bg * group_size
    grid = (num_groups // bg,)

    tok_spec = pl.BlockSpec((block_rows, C), lambda i: (i, 0))

    def full_spec(p):
        assert p.ndim == 2
        return pl.BlockSpec(p.shape, lambda i: (0, 0))

    in_specs = [tok_spec, tok_spec] + [full_spec(p) for p in layer_params]

    # Advisory cost hint so XLA schedules the surrounding gathers/scatters and
    # the 4 sequential layer calls sensibly.
    flops = int(16 * N * C * C + 4 * N * group_size * C)
    transcendentals = int(N * (group_size + 2))
    bytes_accessed = int(
        3 * N * C * x_win.dtype.itemsize
        + sum(int(p.size) * p.dtype.itemsize for p in layer_params))

    return pl.pallas_call(
        partial(_layer_kernel, num_heads, group_size, activation, mm_dtype),
        out_shape=jax.ShapeDtypeStruct((N, C), x_win.dtype),
        grid_spec=pltpu.PrefetchScalarGridSpec(
            num_scalar_prefetch=0,
            grid=grid,
            in_specs=in_specs,
            out_specs=tok_spec,
        ),
        compiler_params=pltpu.CompilerParams(
            dimension_semantics=("parallel",),
            vmem_limit_bytes=64 * 1024 * 1024),
        cost_estimate=pl.CostEstimate(flops=flops,
                                      transcendentals=transcendentals,
                                      bytes_accessed=bytes_accessed),
    )(x_win, pe_win, *layer_params)


def basic_block(x_flat, pe, mappings, params, *, num_heads, group_size,
                activation='relu', mm_dtype=jnp.bfloat16):
    """BasicBlock.forward: 4 BasicLayers over x / x_shift / y / y_shift orderings."""
    # TODO(synk): fold the gather into the kernel via PrefetchScalarGridSpec
    # scalar-prefetched window indices + pl.Element row mapping (in-kernel DMA
    # gather); currently the composed permutation is done as XLA gather/scatter.
    for k, name in enumerate(['x', 'x_shift', 'y', 'y_shift']):
        indices = mappings[name]
        flat2win = mappings['flat2win']
        win2flat = mappings['win2flat']
        # Compose x_flat[indices][flat2win] into a single permuted fetch.
        win_idx = indices[flat2win]
        x_win = x_flat[win_idx]
        pe_win = pe[win_idx]
        out_win = basic_layer_apply(x_win, pe_win, params[k],
                                    num_heads=num_heads,
                                    group_size=group_size,
                                    activation=activation,
                                    mm_dtype=mm_dtype)
        if flat2win.shape[0] == indices.shape[0]:
            # Bijective window mapping (true here): the scatter
            # x_flat[indices] = out_win[win2flat] collapses to one permutation.
            x_flat = x_flat.at[win_idx].set(out_win)
        else:
            # Padded/duplicated window mappings: keep reference two-step scatter.
            x_flat = x_flat.at[indices].set(out_win[win2flat])
    return x_flat


def init_params(key, C, num_layers=4, mm_dtype=jnp.bfloat16):
    """Deterministic synthetic parameters matching torch module shapes.

    Matmul weights are pre-transposed (for x @ W) and cast to bf16 for the MXU;
    biases and LayerNorm parameters stay f32."""
    layers = []
    for l in range(num_layers):
        ks = jax.random.split(jax.random.fold_in(key, l), 8)

        def w(k, shape, scale=0.05):
            return jax.random.normal(k, shape, jnp.float32) * scale

        in_proj_w = w(ks[0], (3 * C, C))                 # torch: (3C, C)
        in_proj_b = w(ks[1], (3 * C,), 0.01)
        wqk = jnp.concatenate([in_proj_w[:C].T, in_proj_w[C:2 * C].T], axis=1)  # (C, 2C)
        bqk = in_proj_b[:2 * C].reshape(1, 2 * C)        # [bq | bk]
        wv = in_proj_w[2 * C:].T                         # (C, C)
        bv = in_proj_b[2 * C:].reshape(1, C)
        wo = w(ks[2], (C, C)).T                          # out_proj
        bo = w(ks[3], (C,), 0.01).reshape(1, C)
        w1 = w(ks[4], (2 * C, C)).T                      # fc1: (C, 2C)
        b1 = w(ks[5], (2 * C,), 0.01).reshape(1, 2 * C)
        w2 = w(ks[6], (C, 2 * C)).T                      # fc2: (2C, C)
        b2 = w(ks[7], (C,), 0.01).reshape(1, C)
        ln = jnp.concatenate([jnp.ones((1, C), jnp.float32),
                              jnp.zeros((1, C), jnp.float32),
                              jnp.ones((1, C), jnp.float32),
                              jnp.zeros((1, C), jnp.float32)], axis=0)  # (4, C)
        layers.append((wqk.astype(mm_dtype), bqk,
                       wv.astype(mm_dtype), bv,
                       wo.astype(mm_dtype), bo,
                       w1.astype(mm_dtype), b1,
                       w2.astype(mm_dtype), b2,
                       ln))
    return layers


if __name__ == "__main__":
    C = 32           # in_channels  (real models with C >= 128 are lane-dense)
    H = 4            # num_heads
    G = 8            # group_size
    N = 64           # number of flat tokens (voxels), divisible by group_size

    key = jax.random.PRNGKey(0)
    k_x, k_pe, k_map, k_par = jax.random.split(key, 4)

    x_flat = jax.random.normal(k_x, (N, C), jnp.float32)
    pe = jax.random.normal(k_pe, (N, C), jnp.float32)

    # Synthetic FlatFormer mappings: 4 orderings + flat<->window permutations.
    map_keys = jax.random.split(k_map, 5)
    mappings = {}
    for i, name in enumerate(['x', 'x_shift', 'y', 'y_shift']):
        mappings[name] = jax.random.permutation(map_keys[i], N)
    flat2win = jax.random.permutation(map_keys[4], N)
    mappings['flat2win'] = flat2win
    mappings['win2flat'] = jnp.argsort(flat2win)   # inverse permutation

    params = init_params(k_par, C, num_layers=4)

    out = basic_block(x_flat, pe, mappings, params,
                      num_heads=H, group_size=G, activation='relu')
    jax.block_until_ready(out)
    assert out.shape == (N, C) and out.dtype == jnp.float32
    print("KERNEL_OK")
</pallas_src>

<mosaic_0001>
module attributes {stable_mosaic.version = 11 : i64} {
  func.func @_layer_kernel(%arg0: i32, %arg1: memref<32x32xf32, #tpu.memory_space<vmem>>, %arg2: memref<32x32xf32, #tpu.memory_space<vmem>>, %arg3: memref<32x64xbf16, #tpu.memory_space<vmem>>, %arg4: memref<1x64xf32, #tpu.memory_space<vmem>>, %arg5: memref<32x32xbf16, #tpu.memory_space<vmem>>, %arg6: memref<1x32xf32, #tpu.memory_space<vmem>>, %arg7: memref<32x32xbf16, #tpu.memory_space<vmem>>, %arg8: memref<1x32xf32, #tpu.memory_space<vmem>>, %arg9: memref<32x64xbf16, #tpu.memory_space<vmem>>, %arg10: memref<1x64xf32, #tpu.memory_space<vmem>>, %arg11: memref<64x32xbf16, #tpu.memory_space<vmem>>, %arg12: memref<1x32xf32, #tpu.memory_space<vmem>>, %arg13: memref<4x32xf32, #tpu.memory_space<vmem>>, %arg14: memref<32x32xf32, #tpu.memory_space<vmem>>) attributes {dimension_semantics = [#tpu.dimension_semantics<parallel>], iteration_bounds = array<i64: 2>, scalar_prefetch = 0 : i64, scratch_operands = 0 : i64, tpu.core_type = #tpu.core_type<tc>, window_params = [{transform_indices = @transform_0, window_bounds = array<i64: 32, 32>}, {transform_indices = @transform_1, window_bounds = array<i64: 32, 32>}, {pipeline_mode = #tpu.pipeline_mode<synchronous>, transform_indices = @transform_2, window_bounds = array<i64: 32, 64>}, {pipeline_mode = #tpu.pipeline_mode<synchronous>, transform_indices = @transform_3, window_bounds = array<i64: 1, 64>}, {pipeline_mode = #tpu.pipeline_mode<synchronous>, transform_indices = @transform_4, window_bounds = array<i64: 32, 32>}, {pipeline_mode = #tpu.pipeline_mode<synchronous>, transform_indices = @transform_5, window_bounds = array<i64: 1, 32>}, {pipeline_mode = #tpu.pipeline_mode<synchronous>, transform_indices = @transform_6, window_bounds = array<i64: 32, 32>}, {pipeline_mode = #tpu.pipeline_mode<synchronous>, transform_indices = @transform_7, window_bounds = array<i64: 1, 32>}, {pipeline_mode = #tpu.pipeline_mode<synchronous>, transform_indices = @transform_8, window_bounds = array<i64: 32, 64>}, {pipeline_mode = #tpu.pipeline_mode<synchronous>, transform_indices = @transform_9, window_bounds = array<i64: 1, 64>}, {pipeline_mode = #tpu.pipeline_mode<synchronous>, transform_indices = @transform_10, window_bounds = array<i64: 64, 32>}, {pipeline_mode = #tpu.pipeline_mode<synchronous>, transform_indices = @transform_11, window_bounds = array<i64: 1, 32>}, {pipeline_mode = #tpu.pipeline_mode<synchronous>, transform_indices = @transform_12, window_bounds = array<i64: 4, 32>}, {transform_indices = @transform_13, window_bounds = array<i64: 32, 32>}]} {
    %c0 = arith.constant 0 : index
    %c0_0 = arith.constant 0 : index
    %0 = vector.load %arg1[%c0, %c0_0] : memref<32x32xf32, #tpu.memory_space<vmem>>, vector<32x32xf32>
    %c0_1 = arith.constant 0 : index
    %c0_2 = arith.constant 0 : index
    %1 = vector.load %arg2[%c0_1, %c0_2] : memref<32x32xf32, #tpu.memory_space<vmem>>, vector<32x32xf32>
    %2 = arith.addf %0, %1 : vector<32x32xf32>
    %3 = arith.truncf %2 : vector<32x32xf32> to vector<32x32xbf16>
    %c0_3 = arith.constant 0 : index
    %c0_4 = arith.constant 0 : index
    %4 = vector.load %arg3[%c0_3, %c0_4] : memref<32x64xbf16, #tpu.memory_space<vmem>>, vector<32x64xbf16>
    %cst = arith.constant dense<0.000000e+00> : vector<32x64xf32>
    %5 = tpu.matmul %3, %4, %cst {dimension_numbers = #tpu.dot_dimension_numbers<[1], [0], [0], [1], [0, 0, 1, 1], [], []>} : vector<32x32xbf16>, vector<32x64xbf16>, vector<32x64xf32> -> vector<32x64xf32>
    %c0_5 = arith.constant 0 : index
    %c0_6 = arith.constant 0 : index
    %6 = vector.load %arg4[%c0_5, %c0_6] : memref<1x64xf32, #tpu.memory_space<vmem>>, vector<1x64xf32>
    %7 = vector.broadcast %6 : vector<1x64xf32> to vector<32x64xf32>
    %8 = arith.addf %5, %7 : vector<32x64xf32>
    %9 = arith.truncf %0 : vector<32x32xf32> to vector<32x32xbf16>
    %c0_7 = arith.constant 0 : index
    %c0_8 = arith.constant 0 : index
    %10 = vector.load %arg5[%c0_7, %c0_8] : memref<32x32xbf16, #tpu.memory_space<vmem>>, vector<32x32xbf16>
    %cst_9 = arith.constant dense<0.000000e+00> : vector<32x32xf32>
    %11 = tpu.matmul %9, %10, %cst_9 {dimension_numbers = #tpu.dot_dimension_numbers<[1], [0], [0], [1], [0, 0, 1, 1], [], []>} : vector<32x32xbf16>, vector<32x32xbf16>, vector<32x32xf32> -> vector<32x32xf32>
    %c0_10 = arith.constant 0 : index
    %c0_11 = arith.constant 0 : index
    %12 = vector.load %arg6[%c0_10, %c0_11] : memref<1x32xf32, #tpu.memory_space<vmem>>, vector<1x32xf32>
    %13 = vector.broadcast %12 : vector<1x32xf32> to vector<32x32xf32>
    %14 = arith.addf %11, %13 : vector<32x32xf32>
    %15 = vector.extract_strided_slice %8 {offsets = [0, 0], sizes = [32, 32], strides = [1, 1]} : vector<32x64xf32> to vector<32x32xf32>
    %cst_12 = arith.constant 0.353553385 : f32
    %16 = vector.broadcast %cst_12 : f32 to vector<32x32xf32>
    %17 = arith.mulf %15, %16 : vector<32x32xf32>
    %18 = vector.extract_strided_slice %8 {offsets = [0, 32], sizes = [32, 32], strides = [1, 1]} : vector<32x64xf32> to vector<32x32xf32>
    %19 = vector.shape_cast %17 : vector<32x32xf32> to vector<4x8x32xf32>
    %20 = vector.shape_cast %18 : vector<32x32xf32> to vector<4x8x32xf32>
    %21 = vector.shape_cast %14 : vector<32x32xf32> to vector<4x8x32xf32>
    %22 = vector.extract_strided_slice %19 {offsets = [0, 0, 0], sizes = [4, 8, 8], strides = [1, 1, 1]} : vector<4x8x32xf32> to vector<4x8x8xf32>
    %23 = arith.truncf %22 : vector<4x8x8xf32> to vector<4x8x8xbf16>
    %24 = vector.extract_strided_slice %20 {offsets = [0, 0, 0], sizes = [4, 8, 8], strides = [1, 1, 1]} : vector<4x8x32xf32> to vector<4x8x8xf32>
    %25 = arith.truncf %24 : vector<4x8x8xf32> to vector<4x8x8xbf16>
    %26 = vector.extract_strided_slice %21 {offsets = [0, 0, 0], sizes = [4, 8, 8], strides = [1, 1, 1]} : vector<4x8x32xf32> to vector<4x8x8xf32>
    %27 = arith.truncf %26 : vector<4x8x8xf32> to vector<4x8x8xbf16>
    "tpu.trace_start"() <{level = 10 : i32, message = "bqd,bkd->bqk"}> : () -> ()
    %cst_13 = arith.constant dense<0.000000e+00> : vector<4x8x8xf32>
    %28 = tpu.matmul %23, %25, %cst_13 {dimension_numbers = #tpu.dot_dimension_numbers<[2], [2], [1], [1], [0, 0, 0, 1, 1, 1], [0], [0]>} : vector<4x8x8xbf16>, vector<4x8x8xbf16>, vector<4x8x8xf32> -> vector<4x8x8xf32>
    "tpu.trace_stop"() : () -> ()
    %cst_14 = arith.constant dense<0xFF800000> : vector<4x8xf32>
    %29 = vector.multi_reduction <maximumf>, %28, %cst_14 [2] : vector<4x8x8xf32> to vector<4x8xf32>
    %30 = vector.shape_cast %29 : vector<4x8xf32> to vector<4x8x1xf32>
    %31 = vector.broadcast %30 : vector<4x8x1xf32> to vector<4x8x8xf32>
    %32 = arith.subf %28, %31 : vector<4x8x8xf32>
    %33 = math.exp %32 : vector<4x8x8xf32>
    %cst_15 = arith.constant dense<0.000000e+00> : vector<4x8xf32>
    %34 = vector.multi_reduction <add>, %33, %cst_15 [2] : vector<4x8x8xf32> to vector<4x8xf32>
    %35 = vector.shape_cast %34 : vector<4x8xf32> to vector<4x8x1xf32>
    %36 = tpu.reciprocal %35 {approx = true} : vector<4x8x1xf32> -> vector<4x8x1xf32>
    %37 = vector.broadcast %36 : vector<4x8x1xf32> to vector<4x8x8xf32>
    %38 = arith.mulf %33, %37 : vector<4x8x8xf32>
    %39 = arith.truncf %38 : vector<4x8x8xf32> to vector<4x8x8xbf16>
    "tpu.trace_start"() <{level = 10 : i32, message = "bqk,bkd->bqd"}> : () -> ()
    %cst_16 = arith.constant dense<0.000000e+00> : vector<4x8x8xf32>
    %40 = tpu.matmul %39, %27, %cst_16 {dimension_numbers = #tpu.dot_dimension_numbers<[2], [1], [1], [2], [0, 0, 0, 1, 1, 2], [0], [0]>} : vector<4x8x8xbf16>, vector<4x8x8xbf16>, vector<4x8x8xf32> -> vector<4x8x8xf32>
    "tpu.trace_stop"() : () -> ()
    %41 = vector.extract_strided_slice %19 {offsets = [0, 0, 8], sizes = [4, 8, 8], strides = [1, 1, 1]} : vector<4x8x32xf32> to vector<4x8x8xf32>
    %42 = arith.truncf %41 : vector<4x8x8xf32> to vector<4x8x8xbf16>
    %43 = vector.extract_strided_slice %20 {offsets = [0, 0, 8], sizes = [4, 8, 8], strides = [1, 1, 1]} : vector<4x8x32xf32> to vector<4x8x8xf32>
    %44 = arith.truncf %43 : vector<4x8x8xf32> to vector<4x8x8xbf16>
    %45 = vector.extract_strided_slice %21 {offsets = [0, 0, 8], sizes = [4, 8, 8], strides = [1, 1, 1]} : vector<4x8x32xf32> to vector<4x8x8xf32>
    %46 = arith.truncf %45 : vector<4x8x8xf32> to vector<4x8x8xbf16>
    "tpu.trace_start"() <{level = 10 : i32, message = "bqd,bkd->bqk"}> : () -> ()
    %cst_17 = arith.constant dense<0.000000e+00> : vector<4x8x8xf32>
    %47 = tpu.matmul %42, %44, %cst_17 {dimension_numbers = #tpu.dot_dimension_numbers<[2], [2], [1], [1], [0, 0, 0, 1, 1, 1], [0], [0]>} : vector<4x8x8xbf16>, vector<4x8x8xbf16>, vector<4x8x8xf32> -> vector<4x8x8xf32>
    "tpu.trace_stop"() : () -> ()
    %cst_18 = arith.constant dense<0xFF800000> : vector<4x8xf32>
    %48 = vector.multi_reduction <maximumf>, %47, %cst_18 [2] : vector<4x8x8xf32> to vector<4x8xf32>
    %49 = vector.shape_cast %48 : vector<4x8xf32> to vector<4x8x1xf32>
    %50 = vector.broadcast %49 : vector<4x8x1xf32> to vector<4x8x8xf32>
    %51 = arith.subf %47, %50 : vector<4x8x8xf32>
    %52 = math.exp %51 : vector<4x8x8xf32>
    %cst_19 = arith.constant dense<0.000000e+00> : vector<4x8xf32>
    %53 = vector.multi_reduction <add>, %52, %cst_19 [2] : vector<4x8x8xf32> to vector<4x8xf32>
    %54 = vector.shape_cast %53 : vector<4x8xf32> to vector<4x8x1xf32>
    %55 = tpu.reciprocal %54 {approx = true} : vector<4x8x1xf32> -> vector<4x8x1xf32>
    %56 = vector.broadcast %55 : vector<4x8x1xf32> to vector<4x8x8xf32>
    %57 = arith.mulf %52, %56 : vector<4x8x8xf32>
    %58 = arith.truncf %57 : vector<4x8x8xf32> to vector<4x8x8xbf16>
    "tpu.trace_start"() <{level = 10 : i32, message = "bqk,bkd->bqd"}> : () -> ()
    %cst_20 = arith.constant dense<0.000000e+00> : vector<4x8x8xf32>
    %59 = tpu.matmul %58, %46, %cst_20 {dimension_numbers = #tpu.dot_dimension_numbers<[2], [1], [1], [2], [0, 0, 0, 1, 1, 2], [0], [0]>} : vector<4x8x8xbf16>, vector<4x8x8xbf16>, vector<4x8x8xf32> -> vector<4x8x8xf32>
    "tpu.trace_stop"() : () -> ()
    %60 = vector.extract_strided_slice %19 {offsets = [0, 0, 16], sizes = [4, 8, 8], strides = [1, 1, 1]} : vector<4x8x32xf32> to vector<4x8x8xf32>
    %61 = arith.truncf %60 : vector<4x8x8xf32> to vector<4x8x8xbf16>
    %62 = vector.extract_strided_slice %20 {offsets = [0, 0, 16], sizes = [4, 8, 8], strides = [1, 1, 1]} : vector<4x8x32xf32> to vector<4x8x8xf32>
    %63 = arith.truncf %62 : vector<4x8x8xf32> to vector<4x8x8xbf16>
    %64 = vector.extract_strided_slice %21 {offsets = [0, 0, 16], sizes = [4, 8, 8], strides = [1, 1, 1]} : vector<4x8x32xf32> to vector<4x8x8xf32>
    %65 = arith.truncf %64 : vector<4x8x8xf32> to vector<4x8x8xbf16>
    "tpu.trace_start"() <{level = 10 : i32, message = "bqd,bkd->bqk"}> : () -> ()
    %cst_21 = arith.constant dense<0.000000e+00> : vector<4x8x8xf32>
    %66 = tpu.matmul %61, %63, %cst_21 {dimension_numbers = #tpu.dot_dimension_numbers<[2], [2], [1], [1], [0, 0, 0, 1, 1, 1], [0], [0]>} : vector<4x8x8xbf16>, vector<4x8x8xbf16>, vector<4x8x8xf32> -> vector<4x8x8xf32>
    "tpu.trace_stop"() : () -> ()
    %cst_22 = arith.constant dense<0xFF800000> : vector<4x8xf32>
    %67 = vector.multi_reduction <maximumf>, %66, %cst_22 [2] : vector<4x8x8xf32> to vector<4x8xf32>
    %68 = vector.shape_cast %67 : vector<4x8xf32> to vector<4x8x1xf32>
    %69 = vector.broadcast %68 : vector<4x8x1xf32> to vector<4x8x8xf32>
    %70 = arith.subf %66, %69 : vector<4x8x8xf32>
    %71 = math.exp %70 : vector<4x8x8xf32>
    %cst_23 = arith.constant dense<0.000000e+00> : vector<4x8xf32>
    %72 = vector.multi_reduction <add>, %71, %cst_23 [2] : vector<4x8x8xf32> to vector<4x8xf32>
    %73 = vector.shape_cast %72 : vector<4x8xf32> to vector<4x8x1xf32>
    %74 = tpu.reciprocal %73 {approx = true} : vector<4x8x1xf32> -> vector<4x8x1xf32>
    %75 = vector.broadcast %74 : vector<4x8x1xf32> to vector<4x8x8xf32>
    %76 = arith.mulf %71, %75 : vector<4x8x8xf32>
    %77 = arith.truncf %76 : vector<4x8x8xf32> to vector<4x8x8xbf16>
    "tpu.trace_start"() <{level = 10 : i32, message = "bqk,bkd->bqd"}> : () -> ()
    %cst_24 = arith.constant dense<0.000000e+00> : vector<4x8x8xf32>
    %78 = tpu.matmul %77, %65, %cst_24 {dimension_numbers = #tpu.dot_dimension_numbers<[2], [1], [1], [2], [0, 0, 0, 1, 1, 2], [0], [0]>} : vector<4x8x8xbf16>, vector<4x8x8xbf16>, vector<4x8x8xf32> -> vector<4x8x8xf32>
    "tpu.trace_stop"() : () -> ()
    %79 = vector.extract_strided_slice %19 {offsets = [0, 0, 24], sizes = [4, 8, 8], strides = [1, 1, 1]} : vector<4x8x32xf32> to vector<4x8x8xf32>
    %80 = arith.truncf %79 : vector<4x8x8xf32> to vector<4x8x8xbf16>
    %81 = vector.extract_strided_slice %20 {offsets = [0, 0, 24], sizes = [4, 8, 8], strides = [1, 1, 1]} : vector<4x8x32xf32> to vector<4x8x8xf32>
    %82 = arith.truncf %81 : vector<4x8x8xf32> to vector<4x8x8xbf16>
    %83 = vector.extract_strided_slice %21 {offsets = [0, 0, 24], sizes = [4, 8, 8], strides = [1, 1, 1]} : vector<4x8x32xf32> to vector<4x8x8xf32>
    %84 = arith.truncf %83 : vector<4x8x8xf32> to vector<4x8x8xbf16>
    "tpu.trace_start"() <{level = 10 : i32, message = "bqd,bkd->bqk"}> : () -> ()
    %cst_25 = arith.constant dense<0.000000e+00> : vector<4x8x8xf32>
    %85 = tpu.matmul %80, %82, %cst_25 {dimension_numbers = #tpu.dot_dimension_numbers<[2], [2], [1], [1], [0, 0, 0, 1, 1, 1], [0], [0]>} : vector<4x8x8xbf16>, vector<4x8x8xbf16>, vector<4x8x8xf32> -> vector<4x8x8xf32>
    "tpu.trace_stop"() : () -> ()
    %cst_26 = arith.constant dense<0xFF800000> : vector<4x8xf32>
    %86 = vector.multi_reduction <maximumf>, %85, %cst_26 [2] : vector<4x8x8xf32> to vector<4x8xf32>
    %87 = vector.shape_cast %86 : vector<4x8xf32> to vector<4x8x1xf32>
    %88 = vector.broadcast %87 : vector<4x8x1xf32> to vector<4x8x8xf32>
    %89 = arith.subf %85, %88 : vector<4x8x8xf32>
    %90 = math.exp %89 : vector<4x8x8xf32>
    %cst_27 = arith.constant dense<0.000000e+00> : vector<4x8xf32>
    %91 = vector.multi_reduction <add>, %90, %cst_27 [2] : vector<4x8x8xf32> to vector<4x8xf32>
    %92 = vector.shape_cast %91 : vector<4x8xf32> to vector<4x8x1xf32>
    %93 = tpu.reciprocal %92 {approx = true} : vector<4x8x1xf32> -> vector<4x8x1xf32>
    %94 = vector.broadcast %93 : vector<4x8x1xf32> to vector<4x8x8xf32>
    %95 = arith.mulf %90, %94 : vector<4x8x8xf32>
    %96 = arith.truncf %95 : vector<4x8x8xf32> to vector<4x8x8xbf16>
    "tpu.trace_start"() <{level = 10 : i32, message = "bqk,bkd->bqd"}> : () -> ()
    %cst_28 = arith.constant dense<0.000000e+00> : vector<4x8x8xf32>
    %97 = tpu.matmul %96, %84, %cst_28 {dimension_numbers = #tpu.dot_dimension_numbers<[2], [1], [1], [2], [0, 0, 0, 1, 1, 2], [0], [0]>} : vector<4x8x8xbf16>, vector<4x8x8xbf16>, vector<4x8x8xf32> -> vector<4x8x8xf32>
    "tpu.trace_stop"() : () -> ()
    %98 = tpu.concatenate %40, %59, %78, %97 in 2 : vector<4x8x8xf32>, vector<4x8x8xf32>, vector<4x8x8xf32>, vector<4x8x8xf32> -> vector<4x8x32xf32>
    %99 = vector.shape_cast %98 : vector<4x8x32xf32> to vector<32x32xf32>
    %100 = arith.truncf %99 : vector<32x32xf32> to vector<32x32xbf16>
    %c0_29 = arith.constant 0 : index
    %c0_30 = arith.constant 0 : index
    %101 = vector.load %arg7[%c0_29, %c0_30] : memref<32x32xbf16, #tpu.memory_space<vmem>>, vector<32x32xbf16>
    %cst_31 = arith.constant dense<0.000000e+00> : vector<32x32xf32>
    %102 = tpu.matmul %100, %101, %cst_31 {dimension_numbers = #tpu.dot_dimension_numbers<[1], [0], [0], [1], [0, 0, 1, 1], [], []>} : vector<32x32xbf16>, vector<32x32xbf16>, vector<32x32xf32> -> vector<32x32xf32>
    %c0_32 = arith.constant 0 : index
    %c0_33 = arith.constant 0 : index
    %103 = vector.load %arg8[%c0_32, %c0_33] : memref<1x32xf32, #tpu.memory_space<vmem>>, vector<1x32xf32>
    %104 = vector.broadcast %103 : vector<1x32xf32> to vector<32x32xf32>
    %105 = arith.addf %102, %104 : vector<32x32xf32>
    %c0_34 = arith.constant 0 : index
    %c0_35 = arith.constant 0 : index
    %106 = vector.load %arg13[%c0_34, %c0_35] : memref<4x32xf32, #tpu.memory_space<vmem>>, vector<4x32xf32>
    %107 = arith.addf %0, %105 : vector<32x32xf32>
    %108 = vector.extract_strided_slice %106 {offsets = [0, 0], sizes = [1, 32], strides = [1, 1]} : vector<4x32xf32> to vector<1x32xf32>
    %109 = vector.extract_strided_slice %106 {offsets = [1, 0], sizes = [1, 32], strides = [1, 1]} : vector<4x32xf32> to vector<1x32xf32>
    %cst_36 = arith.constant dense<0.000000e+00> : vector<32xf32>
    %110 = vector.multi_reduction <add>, %107, %cst_36 [1] : vector<32x32xf32> to vector<32xf32>
    %111 = vector.shape_cast %110 : vector<32xf32> to vector<32x1xf32>
    %cst_37 = arith.constant 3.200000e+01 : f32
    %112 = vector.broadcast %cst_37 : f32 to vector<32x1xf32>
    %113 = arith.divf %111, %112 : vector<32x1xf32>
    %114 = vector.broadcast %113 : vector<32x1xf32> to vector<32x32xf32>
    %115 = arith.subf %107, %114 : vector<32x32xf32>
    %116 = arith.mulf %115, %115 : vector<32x32xf32>
    %cst_38 = arith.constant dense<0.000000e+00> : vector<32xf32>
    %117 = vector.multi_reduction <add>, %116, %cst_38 [1] : vector<32x32xf32> to vector<32xf32>
    %118 = vector.shape_cast %117 : vector<32xf32> to vector<32x1xf32>
    %cst_39 = arith.constant 3.200000e+01 : f32
    %119 = vector.broadcast %cst_39 : f32 to vector<32x1xf32>
    %120 = arith.divf %118, %119 : vector<32x1xf32>
    %121 = vector.broadcast %113 : vector<32x1xf32> to vector<32x32xf32>
    %122 = arith.subf %107, %121 : vector<32x32xf32>
    %cst_40 = arith.constant 9.99999974E-6 : f32
    %123 = vector.broadcast %cst_40 : f32 to vector<32x1xf32>
    %124 = arith.addf %120, %123 : vector<32x1xf32>
    %125 = math.rsqrt %124 : vector<32x1xf32>
    %126 = vector.broadcast %125 : vector<32x1xf32> to vector<32x32xf32>
    %127 = arith.mulf %122, %126 : vector<32x32xf32>
    %128 = vector.broadcast %108 : vector<1x32xf32> to vector<32x32xf32>
    %129 = arith.mulf %127, %128 : vector<32x32xf32>
    %130 = vector.broadcast %109 : vector<1x32xf32> to vector<32x32xf32>
    %131 = arith.addf %129, %130 : vector<32x32xf32>
    %132 = arith.truncf %131 : vector<32x32xf32> to vector<32x32xbf16>
    %c0_41 = arith.constant 0 : index
    %c0_42 = arith.constant 0 : index
    %133 = vector.load %arg9[%c0_41, %c0_42] : memref<32x64xbf16, #tpu.memory_space<vmem>>, vector<32x64xbf16>
    %cst_43 = arith.constant dense<0.000000e+00> : vector<32x64xf32>
    %134 = tpu.matmul %132, %133, %cst_43 {dimension_numbers = #tpu.dot_dimension_numbers<[1], [0], [0], [1], [0, 0, 1, 1], [], []>} : vector<32x32xbf16>, vector<32x64xbf16>, vector<32x64xf32> -> vector<32x64xf32>
    %c0_44 = arith.constant 0 : index
    %c0_45 = arith.constant 0 : index
    %135 = vector.load %arg10[%c0_44, %c0_45] : memref<1x64xf32, #tpu.memory_space<vmem>>, vector<1x64xf32>
    %136 = vector.broadcast %135 : vector<1x64xf32> to vector<32x64xf32>
    %137 = arith.addf %134, %136 : vector<32x64xf32>
    %cst_46 = arith.constant 0.000000e+00 : f32
    %138 = vector.broadcast %cst_46 : f32 to vector<32x64xf32>
    %139 = arith.maximumf %137, %138 : vector<32x64xf32>
    %140 = arith.truncf %139 : vector<32x64xf32> to vector<32x64xbf16>
    %c0_47 = arith.constant 0 : index
    %c0_48 = arith.constant 0 : index
    %141 = vector.load %arg11[%c0_47, %c0_48] : memref<64x32xbf16, #tpu.memory_space<vmem>>, vector<64x32xbf16>
    %cst_49 = arith.constant dense<0.000000e+00> : vector<32x32xf32>
    %142 = tpu.matmul %140, %141, %cst_49 {dimension_numbers = #tpu.dot_dimension_numbers<[1], [0], [0], [1], [0, 0, 1, 1], [], []>} : vector<32x64xbf16>, vector<64x32xbf16>, vector<32x32xf32> -> vector<32x32xf32>
    %c0_50 = arith.constant 0 : index
    %c0_51 = arith.constant 0 : index
    %143 = vector.load %arg12[%c0_50, %c0_51] : memref<1x32xf32, #tpu.memory_space<vmem>>, vector<1x32xf32>
    %144 = vector.broadcast %143 : vector<1x32xf32> to vector<32x32xf32>
    %145 = arith.addf %142, %144 : vector<32x32xf32>
    %146 = arith.addf %131, %145 : vector<32x32xf32>
    %147 = vector.extract_strided_slice %106 {offsets = [2, 0], sizes = [1, 32], strides = [1, 1]} : vector<4x32xf32> to vector<1x32xf32>
    %148 = vector.extract_strided_slice %106 {offsets = [3, 0], sizes = [1, 32], strides = [1, 1]} : vector<4x32xf32> to vector<1x32xf32>
    %cst_52 = arith.constant dense<0.000000e+00> : vector<32xf32>
    %149 = vector.multi_reduction <add>, %146, %cst_52 [1] : vector<32x32xf32> to vector<32xf32>
    %150 = vector.shape_cast %149 : vector<32xf32> to vector<32x1xf32>
    %cst_53 = arith.constant 3.200000e+01 : f32
    %151 = vector.broadcast %cst_53 : f32 to vector<32x1xf32>
    %152 = arith.divf %150, %151 : vector<32x1xf32>
    %153 = vector.broadcast %152 : vector<32x1xf32> to vector<32x32xf32>
    %154 = arith.subf %146, %153 : vector<32x32xf32>
    %155 = arith.mulf %154, %154 : vector<32x32xf32>
    %cst_54 = arith.constant dense<0.000000e+00> : vector<32xf32>
    %156 = vector.multi_reduction <add>, %155, %cst_54 [1] : vector<32x32xf32> to vector<32xf32>
    %157 = vector.shape_cast %156 : vector<32xf32> to vector<32x1xf32>
    %cst_55 = arith.constant 3.200000e+01 : f32
    %158 = vector.broadcast %cst_55 : f32 to vector<32x1xf32>
    %159 = arith.divf %157, %158 : vector<32x1xf32>
    %160 = vector.broadcast %152 : vector<32x1xf32> to vector<32x32xf32>
    %161 = arith.subf %146, %160 : vector<32x32xf32>
    %cst_56 = arith.constant 9.99999974E-6 : f32
    %162 = vector.broadcast %cst_56 : f32 to vector<32x1xf32>
    %163 = arith.addf %159, %162 : vector<32x1xf32>
    %164 = math.rsqrt %163 : vector<32x1xf32>
    %165 = vector.broadcast %164 : vector<32x1xf32> to vector<32x32xf32>
    %166 = arith.mulf %161, %165 : vector<32x32xf32>
    %167 = vector.broadcast %147 : vector<1x32xf32> to vector<32x32xf32>
    %168 = arith.mulf %166, %167 : vector<32x32xf32>
    %169 = vector.broadcast %148 : vector<1x32xf32> to vector<32x32xf32>
    %170 = arith.addf %168, %169 : vector<32x32xf32>
    %c0_57 = arith.constant 0 : index
    %c0_58 = arith.constant 0 : index
    %171 = vector.load %arg14[%c0_57, %c0_58] : memref<32x32xf32, #tpu.memory_space<vmem>>, vector<32x32xf32>
    tpu.vector_store %arg14[%c0_57, %c0_58], %170 {strides = array<i32>} : memref<32x32xf32, #tpu.memory_space<vmem>>, vector<32x32xf32>,
    return
  }
  func.func @transform_0(%arg0: i32) -> (i32, i32) {
    %c0_i32 = arith.constant 0 : i32
    %c0_i32_0 = arith.constant 0 : i32
    return %arg0, %c0_i32 : i32, i32
  }
  func.func @transform_1(%arg0: i32) -> (i32, i32) {
    %c0_i32 = arith.constant 0 : i32
    %c0_i32_0 = arith.constant 0 : i32
    return %arg0, %c0_i32 : i32, i32
  }
  func.func @transform_2(%arg0: i32) -> (i32, i32) {
    %c0_i32 = arith.constant 0 : i32
    %c0_i32_0 = arith.constant 0 : i32
    %c0_i32_1 = arith.constant 0 : i32
    return %c0_i32, %c0_i32_0 : i32, i32
  }
  func.func @transform_3(%arg0: i32) -> (i32, i32) {
    %c0_i32 = arith.constant 0 : i32
    %c0_i32_0 = arith.constant 0 : i32
    %c0_i32_1 = arith.constant 0 : i32
    return %c0_i32, %c0_i32_0 : i32, i32
  }
  func.func @transform_4(%arg0: i32) -> (i32, i32) {
    %c0_i32 = arith.constant 0 : i32
    %c0_i32_0 = arith.constant 0 : i32
    %c0_i32_1 = arith.constant 0 : i32
    return %c0_i32, %c0_i32_0 : i32, i32
  }
  func.func @transform_5(%arg0: i32) -> (i32, i32) {
    %c0_i32 = arith.constant 0 : i32
    %c0_i32_0 = arith.constant 0 : i32
    %c0_i32_1 = arith.constant 0 : i32
    return %c0_i32, %c0_i32_0 : i32, i32
  }
  func.func @transform_6(%arg0: i32) -> (i32, i32) {
    %c0_i32 = arith.constant 0 : i32
    %c0_i32_0 = arith.constant 0 : i32
    %c0_i32_1 = arith.constant 0 : i32
    return %c0_i32, %c0_i32_0 : i32, i32
  }
  func.func @transform_7(%arg0: i32) -> (i32, i32) {
    %c0_i32 = arith.constant 0 : i32
    %c0_i32_0 = arith.constant 0 : i32
    %c0_i32_1 = arith.constant 0 : i32
    return %c0_i32, %c0_i32_0 : i32, i32
  }
  func.func @transform_8(%arg0: i32) -> (i32, i32) {
    %c0_i32 = arith.constant 0 : i32
    %c0_i32_0 = arith.constant 0 : i32
    %c0_i32_1 = arith.constant 0 : i32
    return %c0_i32, %c0_i32_0 : i32, i32
  }
  func.func @transform_9(%arg0: i32) -> (i32, i32) {
    %c0_i32 = arith.constant 0 : i32
    %c0_i32_0 = arith.constant 0 : i32
    %c0_i32_1 = arith.constant 0 : i32
    return %c0_i32, %c0_i32_0 : i32, i32
  }
  func.func @transform_10(%arg0: i32) -> (i32, i32) {
    %c0_i32 = arith.constant 0 : i32
    %c0_i32_0 = arith.constant 0 : i32
    %c0_i32_1 = arith.constant 0 : i32
    return %c0_i32, %c0_i32_0 : i32, i32
  }
  func.func @transform_11(%arg0: i32) -> (i32, i32) {
    %c0_i32 = arith.constant 0 : i32
    %c0_i32_0 = arith.constant 0 : i32
    %c0_i32_1 = arith.constant 0 : i32
    return %c0_i32, %c0_i32_0 : i32, i32
  }
  func.func @transform_12(%arg0: i32) -> (i32, i32) {
    %c0_i32 = arith.constant 0 : i32
    %c0_i32_0 = arith.constant 0 : i32
    %c0_i32_1 = arith.constant 0 : i32
    return %c0_i32, %c0_i32_0 : i32, i32
  }
  func.func @transform_13(%arg0: i32) -> (i32, i32) {
    %c0_i32 = arith.constant 0 : i32
    %c0_i32_0 = arith.constant 0 : i32
    return %arg0, %c0_i32 : i32, i32
  }
}

</mosaic_0001>

<bundles_post_ra>
// kernel: tpu_custom_call.1
= control target key start
LH: loop header
LB: loop body
LE: loop exit
PB: predicated region body
PF: predicated region fallthrough
CT: control target
= control target key end

     0   :  { %s2362_s25 = smov 0   ;;  %s2799_s0 = inlined_call_operand.vmem [shape: f32[64,32], index: 0, kind: input, shape index: {}]   ;;  %s2800_s1 = inlined_call_operand.vmem [shape: f32[64,32], index: 1, kind: input, shape index: {}]   ;;  %s2801_s2 = inlined_call_operand.vmem [shape: bf16[32,64], index: 2, kind: input, shape index: {}]   ;;  %s2802_s3 = inlined_call_operand.vmem [shape: f32[1,64], index: 3, kind: input, shape index: {}]   ;;  %s2803_s4 = inlined_call_operand.vmem [shape: bf16[32,32], index: 4, kind: input, shape index: {}]   ;;  %s2804_s5 = inlined_call_operand.vmem [shape: f32[1,32], index: 5, kind: input, shape index: {}]   ;;  %s2805_s6 = inlined_call_operand.vmem [shape: bf16[32,32], index: 6, kind: input, shape index: {}]   ;;  %s2806_s7 = inlined_call_operand.vmem [shape: f32[1,32], index: 7, kind: input, shape index: {}]   ;;  %s2807_s8 = inlined_call_operand.vmem [shape: bf16[32,64], index: 8, kind: input, shape index: {}]   ;;  %s2808_s9 = inlined_call_operand.vmem [shape: f32[1,64], index: 9, kind: input, shape index: {}]   ;;  %s2809_s10 = inlined_call_operand.vmem [shape: bf16[64,32], index: 10, kind: input, shape index: {}]   ;;  %s2810_s11 = inlined_call_operand.vmem [shape: f32[1,32], index: 11, kind: input, shape index: {}]   ;;  %s2811_s12 = inlined_call_operand.vmem [shape: f32[4,32], index: 12, kind: input, shape index: {}]   ;;  %s2812_s13 = inlined_call_operand.vmem [shape: f32[64,32], index: 13, kind: output, shape index: {}]  }
   0x1 LB: > { %s2016_s26 = sadd.s32 4294967295, %s2279_s25   ;;  %p2020_p0 = scmp.ge.s32.totalorder %s2279_s25, 1  ;;  %s2279_s25 = sphi %s2362_s25, %s23_s25  }
   0x2   : > { %p399_p1 = scmp.lt.s32.totalorder %s2279_s25, 3 }
   0x4   : > { %p400_p2 = pnand %p2020_p0, %p399_p1 }
   0x5   : > { %s2021_s29 = sshll.u32 (!%p400_p2), %s2016_s26, 2  ;;  %s2282_s30 = smov (!%p400_p2), 88  }
   0x6   : > { %403 = sbr.rel (%p400_p2) target bundleno = 3106 (0xc22), region = 72  ;;  %p449_p3 = scmp.lt.s32.totalorder (!%p400_p2), %s2021_s29, 7 }
   0x7   : > { %s2283_s16 = smov (!%p400_p2), 120   ;;  %s2284_s17 = smov (!%p400_p2), 80  }
   0x8   : > { %s2285_s18 = smov (!%p400_p2), 112   ;;  %s2286_s20 = smov (!%p400_p2), 72  }
   0x9   : > { %s2287_s21 = smov (!%p400_p2), 104   ;;  %s2288_s23 = smov (!%p400_p2), 8  }
   0xa   : > { %s2289_s24 = smov (!%p400_p2), 16  }
   0xb   : > { %v2120_v0 = vld [vmem:[%s2801_s2 + $0x8] sm:$0xff]  ;;  %v2119_v2 = vld [vmem:[%s2801_s2] sm:$0xff]  ;;  %s2814_s29 = smov (!%p449_p3, %s2021_s29), 7  ;;  %vm501_vm0 = vcmask 261120   ;;  %vm595_vm1 = vcmask 64512   ;;  %vm738_vm2 = vcmask 1043456  }
   0xc   : > { %v2122_v1 = vld [vmem:[%s2803_s4 + $0x8] sm:$0xff]  ;;  %514 = vmatpush.bf16.msra.mxu0 %v2120_v0  ;;  %2131 = vmatpush.bf16.msra.mxu3 %v2120_v0  ;;  %v2121_v3 = vld [vmem:[%s2803_s4] sm:$0xff]  ;;  %s2382_s19 = sshll.u32 %s2814_s29, 3  ;;  %s2281_s29 = smov 96   ;;  %vm1560_vm3 = vcmask 130048   ;;  %vm1565_vm4 = vcmask 195584  }
   0xd   : > { %561 = vmatpush.bf16.msra.mxu1 %v2122_v1  ;;  %s2388_s22 = scalar_lea.vmem %s2799_s0, %s2382_s19  ;;  %s458_s26 = scalar_lea.vmem %s2800_s1, %s2382_s19  ;;  %v2182_v20 = vld [vmem:[%s2802_s3] ss:$0 sm:$0xff] }
   0xe   : > { %v467_v4 = vld [vmem:[%s2388_s22] sm:$0xff]  ;;  %v468_v5 = vld [vmem:[%s2388_s22 + $0x8] sm:$0xff]  ;;  %v469_v9 = vld [vmem:[%s2388_s22 + $0x10] sm:$0xff] }
   0xf   : > { %v471_v6 = vld [vmem:[%s458_s26] sm:$0xff]  ;;  %v472_v7 = vld [vmem:[%s458_s26 + $0x8] sm:$0xff]  ;;  %v470_v10 = vld [vmem:[%s2388_s22 + $0x18] sm:$0xff]  ;;  %v527_v18 = vpack.c.bf16 %v468_v5, %v467_v4 }
  0x10   : > { %515 = vmatpush.bf16.msra.mxu0 %v2119_v2  ;;  %2132 = vmatpush.bf16.msra.mxu3 %v2119_v2  ;;  %v475_v8 = vadd.f32 %v471_v6, %v467_v4  ;;  %v476_v11 = vadd.f32 %v472_v7, %v468_v5  ;;  %v473_v12 = vld [vmem:[%s458_s26 + $0x10] sm:$0xff]  ;;  %v474_v13 = vld [vmem:[%s458_s26 + $0x18] sm:$0xff]  ;;  %v528_v19 = vpack.c.bf16 %v470_v10, %v469_v9  ;;  %v2422_v43 = vld [vmem:[%s2804_s5] ss:$0 sm:$0xff]  ;;  %s2290_s26 = smov 24  }
  0x11   : > { %562 = vmatpush.bf16.msra.mxu1 %v2121_v3  ;;  %v477_v14 = vadd.f32 %v473_v12, %v469_v9  ;;  %v478_v15 = vadd.f32 %v474_v13, %v470_v10 }
  0x12   : > { %v479_v16 = vpack.c.bf16 %v476_v11, %v475_v8 }
  0x13   : > { %v480_v17 = vpack.c.bf16 %v478_v15, %v477_v14 }
  0x14   : > { %2035 = vmatmul.msk.bf16.vlgmr.msra.gmra.mxu0 %vm501_vm0, %v479_v16  ;;  %2045 = vmatmul.msk.bf16.vlgmr.msra.gmra.mxu1 %vm501_vm0, %v527_v18 }
  0x15   : > { %2036 = vmatmul.msk.bf16.vlgmr.msra.gmra.mxu3 %vm501_vm0, %v480_v17 }
  0x24   : > { %2046 = vmatmul.msk.bf16.gmra.mxu1 %vm501_vm0, %v528_v19 }
  0x91   : > { %v517_v21 = vpop.f32.mrf.mxu0  ;;  %v564_v41 = vpop.f32.mrf.mxu1 }
  0x92   : > { %v518_v22 = vadd.f32 %v2182_v20, %v517_v21  ;;  %v565_v18 = vadd.f32 %v2422_v43, %v564_v41 }
  0x94   : > { %v582_v23 = vpack.c.bf16 %v518_v22, %v518_v22  ;;  %v574_v48 = vmul.f32 0.35355338, %v518_v22  ;;  %v586_v22 = vpack.c.bf16 %v565_v18, %v565_v18 }
  0x96   : > { %v591_v24 = vunpack.c.l.b16 %v582_v23  ;;  %v578_v50 = vpack.c.bf16 %v574_v48, %v574_v48 }
  0x98   : > { %v2405_v25 = vpack.c.b16 %v591_v24, %v591_v24  ;;  %v522_v26 = vpop.f32.mrf.mxu3  ;;  %v813_v19 = vunpack.c.l.b16 %v578_v50 }
  0x99   : > { %v519_v27 = vpop.f32.mrf.mxu0  ;;  %v523_v28 = vadd.f32 %v2182_v20, %v522_v26  ;;  %v566_v42 = vpop.f32.mrf.mxu1 }
  0x9a   : > { %v520_v29 = vadd.f32 %v2182_v20, %v519_v27  ;;  %593 = vrot.lane.b32.xlu0 %v2405_v25, %s2281_s29  ;;  %v2459_v23 = vpack.c.b16 %v813_v19, %v813_v19  ;;  %v965_v27 = vunpack.c.l.b16 %v586_v22 }
  0x9b   : > { %v584_v30 = vpack.c.bf16 %v523_v28, %v523_v28  ;;  %v576_v60 = vmul.f32 0.35355338, %v523_v28 }
  0x9c   : > { %v583_v31 = vpack.c.bf16 %v520_v29, %v520_v29  ;;  %v575_v56 = vmul.f32 0.35355338, %v520_v29  ;;  %v2467_v29 = vpack.c.b16 %v965_v27, %v965_v27 }
  0x9d   : > { %v640_v32 = vunpack.c.l.b16 %v584_v30  ;;  %v580_v62 = vpack.c.bf16 %v576_v60, %v576_v60 }
  0x9e   : > { %v616_v33 = vunpack.c.l.b16 %v583_v31  ;;  %v579_v57 = vpack.c.bf16 %v575_v56, %v575_v56 }
  0x9f   : > { %v2408_v34 = vpack.c.b16 %v640_v32, %v640_v32  ;;  %v865_v12 = vunpack.c.l.b16 %v580_v62 }
  0xa0   : > { %v2410_v35 = vpack.c.b16 %v616_v33, %v616_v33  ;;  %v524_v36 = vpop.f32.mrf.mxu3  ;;  %v839_v16 = vunpack.c.l.b16 %v579_v57 }
  0xa1   : > { %v525_v37 = vadd.f32 %v2182_v20, %v524_v36  ;;  %642 = vrot.lane.b32.xlu1 %v2408_v34, %s2281_s29  ;;  %869 = vrot.lane.b32.xlu2 %v2408_v34, %s2282_s30  ;;  %v569_v44 = vpop.f32.mrf.mxu1  ;;  %v2447_v14 = vpack.c.b16 %v865_v12, %v865_v12  ;;  %v567_v20 = vadd.f32 %v2422_v43, %v566_v42 }
  0xa2   : > { %618 = vrot.lane.b32.xlu0 %v2410_v35, %s2281_s29  ;;  %v570_v46 = vadd.f32 %v2422_v43, %v569_v44  ;;  %v2453_v17 = vpack.c.b16 %v839_v16, %v839_v16 }
  0xa3   : > { %v585_v38 = vpack.c.bf16 %v525_v37, %v525_v37  ;;  %v577_v0 = vmul.f32 0.35355338, %v525_v37  ;;  %v587_v24 = vpack.c.bf16 %v567_v20, %v567_v20 }
  0xa4   : > { %v588_v49 = vpack.c.bf16 %v570_v46, %v570_v46 }
  0xa5   : > { %v664_v39 = vunpack.c.l.b16 %v585_v38  ;;  %v2434_v1 = vpack.c.bf16 %v577_v0, %v577_v0  ;;  %v989_v28 = vunpack.c.l.b16 %v587_v24  ;;  %v759_v41 = vsel %vm738_vm2, %v587_v24, 0 }
  0xa6   : > { %v778_v54 = vsel %vm738_vm2, %v588_v49, 0  ;;  %v1013_v21 = vunpack.c.l.b16 %v588_v49  ;;  %768 = vmatpush.bf16.msrb.mxu1 %v759_v41 }
  0xa7   : > { %v2416_v40 = vpack.c.b16 %v664_v39, %v664_v39  ;;  %v2469_v30 = vpack.c.b16 %v989_v28, %v989_v28  ;;  %v740_v39 = vsel %vm738_vm2, %v586_v22, 0 }
  0xa8   : > { %v2461_v26 = vpack.c.b16 %v1013_v21, %v1013_v21  ;;  %749 = vmatpush.bf16.msrb.mxu0 %v740_v39 }
  0xa9   : > { %666 = vrot.lane.b32.xlu1 %v2416_v40, %s2281_s29  ;;  %v571_v31 = vpop.f32.mrf.mxu1 }
  0xaa   : > { %v572_v32 = vadd.f32 %v2422_v43, %v571_v31 }
  0xac   : > { %v589_v33 = vpack.c.bf16 %v572_v32, %v572_v32 }
  0xae   : > { %v797_v36 = vsel %vm738_vm2, %v589_v33, 0 }
  0xfb   : > { %v870_v61 = vpop.permute.xlu2 %869 }
  0xfc   : > { %v875_v63 = vsel %vm595_vm1, %v870_v61, 0 }
 0x10c   : > { %v594_v45 = vpop.permute.xlu0 %593 }
 0x10d   : > { %v600_v47 = vsel %vm595_vm1, %v594_v45, 0 }
 0x10e   : > { %609 = vmatpush.bf16.xpose.msra.mxu2 %v600_v47 }
 0x113   : > { %v643_v51 = vpop.permute.xlu1 %642 }
 0x114   : > { %v619_v52 = vpop.permute.xlu0 %618  ;;  %v648_v53 = vsel %vm595_vm1, %v643_v51, 0 }
 0x115   : > { %2047 = vmatmul.msk.bf16.vlgmr.msra.gmra.mxu2 %vm595_vm1, %v578_v50  ;;  %v624_v55 = vsel %vm595_vm1, %v619_v52, 0 }
 0x116   : > { %633 = vmatpush.bf16.xpose.msrb.mxu3 %v624_v55  ;;  %657 = vmatpush.bf16.xpose.msrb.mxu2 %v648_v53 }
 0x11b   : > { %v667_v58 = vpop.permute.xlu1 %666 }
 0x11c   : > { %v672_v59 = vsel %vm595_vm1, %v667_v58, 0 }
 0x11d   : > { %2048 = vmatmul.msk.bf16.vlgmr.msrb.gmra.mxu3 %vm595_vm1, %v579_v57 }
 0x11e   : > { %787 = vmatpush.bf16.msra.mxu2 %v778_v54  ;;  %681 = vmatpush.bf16.xpose.msra.mxu3 %v672_v59 }
 0x125   : > { %2049 = vmatmul.msk.bf16.vlgmr.msrb.gmra.mxu2 %vm595_vm1, %v580_v62 }
 0x126   : > { %884 = vmatpush.bf16.xpose.msrb.mxu2 %v875_v63  ;;  %806 = vmatpush.bf16.msrb.mxu3 %v797_v36 }
 0x12d   : > { %2050 = vmatmul.msk.bf16.vlgmr.msra.gmra.mxu3 %vm595_vm1, %v2434_v1 }
 0x198   : > { %v611_v2 = vpop.f32.mrf.mxu2 }
 0x199   : > { %v687_v3 = vsel %vm595_vm1, %v611_v2, -inf }
 0x19a   : > { %688 = vmax.xlane.f32.xlu0 %v687_v3  ;;  %v891_v3 = vunpack.c.l.b16 %v2434_v1 }
 0x1a0   : > { %v613_v4 = vpop.f32.mrf.mxu2  ;;  %v635_v5 = vpop.f32.mrf.mxu3 }
 0x1a1   : > { %v690_v6 = vsel %vm595_vm1, %v635_v5, -inf  ;;  %v2492_v4 = vpack.c.b16 %v891_v3, %v891_v3 }
 0x1a2   : > { %691 = vmax.xlane.f32.xlu1 %v690_v6 }
 0x1a8   : > { %v637_v7 = vpop.f32.mrf.mxu3  ;;  %v659_v8 = vpop.f32.mrf.mxu2 }
 0x1a9   : > { %v693_v9 = vsel %vm595_vm1, %v659_v8, -inf }
 0x1aa   : > { %694 = vmax.xlane.f32.xlu2 %v693_v9 }
 0x1ae   : > { %895 = vrot.lane.b32.xlu0 %v2416_v40, %s2282_s30 }
 0x1b0   : > { %v661_v10 = vpop.f32.mrf.mxu2  ;;  %v2443_v11 = vpop.f32.mrf.mxu3 }
 0x1b1   : > { %v696_v13 = vsel %vm595_vm1, %v2443_v11, -inf }
 0x1b2   : > { %697 = vmax.xlane.f32.xlu2 %v696_v13 }
 0x1b6   : > { %867 = vrot.lane.b32.xlu0 %v2447_v14, %s2283_s16 }
 0x1b8   : > { %v685_v15 = vpop.f32.mrf.mxu3 }
 0x1bb   : > { %817 = vrot.lane.b32.xlu1 %v2405_v25, %s2282_s30 }
 0x1be   : > { %841 = vrot.lane.b32.xlu0 %v2453_v17, %s2283_s16 }
 0x1c3   : > { %815 = vrot.lane.b32.xlu1 %v2459_v23, %s2283_s16 }
 0x1c6   : > { %1015 = vrot.lane.b32.xlu0 %v2461_v26, %s2283_s16 }
 0x1ca   : > { %843 = vrot.lane.b32.xlu2 %v2410_v35, %s2282_s30 }
 0x1cb   : > { %967 = vrot.lane.b32.xlu1 %v2467_v29, %s2283_s16 }
 0x1ce   : > { %991 = vrot.lane.b32.xlu0 %v2469_v30, %s2283_s16 }
 0x1d6   : > { %1131 = vrot.lane.b32.xlu0 %v2416_v40, %s2284_s17 }
 0x20d   : > { %v689_v37 = vpop.xlane.xlu0 %688 }
 0x20e   : > { %v699_v38 = vsub.f32 %v611_v2, %v689_v37 }
 0x210   : > { %v703_v42 = vmul.f32 1.442695, %v699_v38 }
 0x212   : > { %2187 = vpow2.f32 %v703_v42 }
 0x215   : > { %v692_v44 = vpop.xlane.xlu1 %691 }
 0x216   : > { %v700_v45 = vsub.f32 %v635_v5, %v692_v44  ;;  %v1037_v5 = vunpack.c.l.b16 %v589_v33 }
 0x218   : > { %v2188_v46 = vpop.eup %2187  ;;  %v705_v47 = vmul.f32 1.442695, %v700_v45  ;;  %v2496_v6 = vpack.c.b16 %v1037_v5, %v1037_v5 }
 0x219   : > { %v711_v43 = vsel %vm595_vm1, %v2188_v46, 0.0 }
 0x21a   : > { %2189 = vpow2.f32 %v705_v47  ;;  %712 = vadd.xlane.f32.xlu2 %v711_v43 }
 0x21d   : > { %v695_v48 = vpop.xlane.xlu2 %694 }
 0x21e   : > { %v701_v49 = vsub.f32 %v659_v8, %v695_v48 }
 0x220   : > { %v2190_v50 = vpop.eup %2189  ;;  %v707_v51 = vmul.f32 1.442695, %v701_v49  ;;  %v896_v52 = vpop.permute.xlu0 %895 }
 0x221   : > { %v901_v53 = vsel %vm595_vm1, %v896_v52, 0  ;;  %v714_v54 = vsel %vm595_vm1, %v2190_v50, 0.0 }
 0x222   : > { %2191 = vpow2.f32 %v707_v51  ;;  %910 = vmatpush.bf16.xpose.msra.mxu3 %v901_v53  ;;  %715 = vadd.xlane.f32.xlu2 %v714_v54 }
 0x225   : > { %v698_v55 = vpop.xlane.xlu2 %697 }
 0x226   : > { %v702_v56 = vsub.f32 %v2443_v11, %v698_v55 }
 0x228   : > { %v2192_v57 = vpop.eup %2191  ;;  %v709_v58 = vmul.f32 1.442695, %v702_v56  ;;  %v868_v7 = vpop.permute.xlu0 %867 }
 0x229   : > { %v717_v59 = vsel %vm595_vm1, %v2192_v57, 0.0 }
 0x22a   : > { %2193 = vpow2.f32 %v709_v58  ;;  %718 = vadd.xlane.f32.xlu2 %v717_v59 }
 0x22d   : > { %v818_v60 = vpop.permute.xlu1 %817  ;;  %v844_v61 = vpop.permute.xlu2 %843 }
 0x22e   : > { %v823_v62 = vsel %vm595_vm1, %v818_v60, 0  ;;  %v849_v63 = vsel %vm595_vm1, %v844_v61, 0 }
 0x22f   : > { %832 = vmatpush.bf16.xpose.msra.mxu0 %v823_v62  ;;  %858 = vmatpush.bf16.xpose.msra.mxu1 %v849_v63 }
 0x230   : > { %v2194_v0 = vpop.eup %2193  ;;  %v842_v8 = vpop.permute.xlu0 %841 }
 0x231   : > { %v720_v2 = vsel %vm595_vm1, %v2194_v0, 0.0 }
 0x232   : > { %721 = vadd.xlane.f32.xlu2 %v720_v2 }
 0x235   : > { %v816_v15 = vpop.permute.xlu1 %815 }
 0x238   : > { %v1016_v1 = vpop.permute.xlu0 %1015 }
 0x239   : > { %v1021_v33 = vsel %vm738_vm2, %v1016_v1, 0 }
 0x23d   : > { %v968_v24 = vpop.permute.xlu1 %967 }
 0x23e   : > { %v973_v27 = vsel %vm738_vm2, %v968_v24, 0 }
 0x240   : > { %v992_v20 = vpop.permute.xlu0 %991 }
 0x241   : > { %v997_v21 = vsel %vm738_vm2, %v992_v20, 0 }
 0x24a   : > { %893 = vrot.lane.b32.xlu2 %v2492_v4, %s2283_s16 }
 0x252   : > { %1039 = vrot.lane.b32.xlu2 %v2496_v6, %s2283_s16 }
 0x25a   : > { %1108 = vrot.lane.b32.xlu2 %v2408_v34, %s2284_s17 }
 0x28d   : > { %v713_v9 = vpop.xlane.xlu2 %712 }
 0x28e   : > { %2195 = vrcp.f32 %v713_v9 }
 0x294   : > { %v2196_v10 = vpop.eup %2195 }
 0x295   : > { %v727_v11 = vmul.f32 %v2196_v10, %v2188_v46  ;;  %v716_v12 = vpop.xlane.xlu2 %715  ;;  %v1132_v46 = vpop.permute.xlu0 %1131 }
 0x296   : > { %2197 = vrcp.f32 %v716_v12  ;;  %v1137_v43 = vsel %vm595_vm1, %v1132_v46, 0 }
 0x297   : > { %v731_v13 = vpack.c.bf16 %v727_v11, %v727_v11 }
 0x299   : > { %2051 = vmatmul.msk.bf16.vlgmr.msrb.gmra.mxu0 %vm595_vm1, %v731_v13 }
 0x29a   : > { %982 = vmatpush.bf16.msrb.mxu0 %v973_v27 }
 0x29c   : > { %v2198_v16 = vpop.eup %2197 }
 0x29d   : > { %v728_v18 = vmul.f32 %v2198_v16, %v2190_v50  ;;  %v719_v19 = vpop.xlane.xlu2 %718 }
 0x29e   : > { %2199 = vrcp.f32 %v719_v19 }
 0x29f   : > { %v732_v22 = vpack.c.bf16 %v728_v18, %v728_v18 }
 0x2a1   : > { %2052 = vmatmul.msk.bf16.vlgmr.msrb.gmra.mxu1 %vm595_vm1, %v732_v22 }
 0x2a2   : > { %1006 = vmatpush.bf16.msrb.mxu1 %v997_v21 }
 0x2a4   : > { %v2200_v28 = vpop.eup %2199 }
 0x2a5   : > { %v729_v31 = vmul.f32 %v2200_v28, %v2192_v57  ;;  %v722_v32 = vpop.xlane.xlu2 %721 }
 0x2a6   : > { %2201 = vrcp.f32 %v722_v32 }
 0x2a7   : > { %v733_v36 = vpack.c.bf16 %v729_v31, %v729_v31 }
 0x2a9   : > { %2053 = vmatmul.msk.bf16.vlgmr.msra.gmra.mxu2 %vm595_vm1, %v733_v36  ;;  %2055 = vmatmul.msk.bf16.vlgmr.msra.gmra.mxu0 %vm595_vm1, %v816_v15 }
 0x2aa   : > { %1030 = vmatpush.bf16.msra.mxu2 %v1021_v33 }
 0x2ac   : > { %v2202_v37 = vpop.eup %2201 }
 0x2ad   : > { %v730_v38 = vmul.f32 %v2202_v37, %v2194_v0  ;;  %v894_v39 = vpop.permute.xlu2 %893 }
 0x2af   : > { %v734_v41 = vpack.c.bf16 %v730_v38, %v730_v38 }
 0x2b1   : > { %2054 = vmatmul.msk.bf16.vlgmr.msrb.gmra.mxu3 %vm595_vm1, %v734_v41  ;;  %2056 = vmatmul.msk.bf16.vlgmr.msra.gmra.mxu1 %vm595_vm1, %v842_v8 }
 0x2b5   : > { %v1040_v42 = vpop.permute.xlu2 %1039 }
 0x2b6   : > { %v1045_v44 = vsel %vm738_vm2, %v1040_v42, 0 }
 0x2b7   : > { %1054 = vmatpush.bf16.msrb.mxu3 %v1045_v44 }
 0x2b9   : > { %2057 = vmatmul.msk.bf16.vlgmr.msrb.gmra.mxu2 %vm595_vm1, %v868_v7 }
 0x2bd   : > { %v1109_v45 = vpop.permute.xlu2 %1108 }
 0x2be   : > { %v1114_v47 = vsel %vm595_vm1, %v1109_v45, 0 }
 0x2bf   : > { %1123 = vmatpush.bf16.xpose.msrb.mxu2 %v1114_v47 }
 0x2c1   : > { %2058 = vmatmul.msk.bf16.vlgmr.msra.gmra.mxu3 %vm595_vm1, %v894_v39 }
 0x2c2   : > { %1146 = vmatpush.bf16.xpose.msra.mxu3 %v1137_v43 }
 0x316   : > { %v2516_v48 = vpop.f32.mrf.mxu0 }
 0x31e   : > { %v753_v49 = vpop.f32.mrf.mxu0  ;;  %v2518_v50 = vpop.f32.mrf.mxu1 }
 0x326   : > { %v772_v51 = vpop.f32.mrf.mxu1  ;;  %v834_v52 = vpop.f32.mrf.mxu0 }
 0x327   : > { %v916_v53 = vsel %vm595_vm1, %v834_v52, -inf }
 0x328   : > { %917 = vmax.xlane.f32.xlu0 %v916_v53 }
 0x32c   : > { %v2521_v54 = vpop.f32.mrf.mxu2 }
 0x32e   : > { %v836_v55 = vpop.f32.mrf.mxu0  ;;  %v860_v56 = vpop.f32.mrf.mxu1 }
 0x32f   : > { %v919_v57 = vsel %vm595_vm1, %v860_v56, -inf }
 0x330   : > { %920 = vmax.xlane.f32.xlu2 %v919_v57 }
 0x334   : > { %v791_v58 = vpop.f32.mrf.mxu2  ;;  %v2524_v59 = vpop.f32.mrf.mxu3 }
 0x336   : > { %v862_v60 = vpop.f32.mrf.mxu1 }
 0x33c   : > { %1106 = vrot.lane.b32.xlu0 %v2447_v14, %s2285_s18  ;;  %v810_v61 = vpop.f32.mrf.mxu3  ;;  %v886_v62 = vpop.f32.mrf.mxu2 }
 0x33d   : > { %v922_v63 = vsel %vm595_vm1, %v886_v62, -inf }
 0x33e   : > { %923 = vmax.xlane.f32.xlu2 %v922_v63 }
 0x344   : > { %v888_v0 = vpop.f32.mrf.mxu2  ;;  %v912_v2 = vpop.f32.mrf.mxu3 }
 0x345   : > { %v925_v3 = vsel %vm595_vm1, %v912_v2, -inf }
 0x346   : > { %926 = vmax.xlane.f32.xlu1 %v925_v3 }
 0x34c   : > { %v914_v5 = vpop.f32.mrf.mxu3 }
 0x356   : > { %1085 = vrot.lane.b32.xlu2 %v2410_v35, %s2284_s17 }
 0x35f   : > { %1062 = vrot.lane.b32.xlu1 %v2405_v25, %s2284_s17 }
 0x39b   : > { %v918_v7 = vpop.xlane.xlu0 %917 }
 0x39c   : > { %v928_v8 = vsub.f32 %v834_v52, %v918_v7 }
 0x39e   : > { %v932_v9 = vmul.f32 1.442695, %v928_v8 }
 0x3a0   : > { %2203 = vpow2.f32 %v932_v9 }
 0x3a3   : > { %v921_v10 = vpop.xlane.xlu2 %920 }
 0x3a4   : > { %v929_v1 = vsub.f32 %v860_v56, %v921_v10 }
 0x3a6   : > { %v2204_v11 = vpop.eup %2203  ;;  %v934_v12 = vmul.f32 1.442695, %v929_v1 }
 0x3a7   : > { %v940_v13 = vsel %vm595_vm1, %v2204_v11, 0.0 }
 0x3a8   : > { %2205 = vpow2.f32 %v934_v12  ;;  %941 = vadd.xlane.f32.xlu2 %v940_v13 }
 0x3ae   : > { %v2206_v15 = vpop.eup %2205  ;;  %v1107_v49 = vpop.permute.xlu0 %1106 }
 0x3af   : > { %v943_v16 = vsel %vm595_vm1, %v2206_v15, 0.0 }
 0x3b0   : > { %944 = vadd.xlane.f32.xlu1 %v943_v16 }
 0x3b1   : > { %v924_v18 = vpop.xlane.xlu2 %923 }
 0x3b2   : > { %v930_v19 = vsub.f32 %v886_v62, %v924_v18 }
 0x3b4   : > { %v936_v20 = vmul.f32 1.442695, %v930_v19 }
 0x3b6   : > { %2207 = vpow2.f32 %v936_v20 }
 0x3b9   : > { %v927_v21 = vpop.xlane.xlu1 %926  ;;  %v1086_v22 = vpop.permute.xlu2 %1085 }
 0x3ba   : > { %v931_v24 = vsub.f32 %v912_v2, %v927_v21  ;;  %v1091_v27 = vsel %vm595_vm1, %v1086_v22, 0 }
 0x3bb   : > { %1100 = vmatpush.bf16.xpose.msra.mxu1 %v1091_v27 }
 0x3bc   : > { %v2208_v28 = vpop.eup %2207  ;;  %v938_v31 = vmul.f32 1.442695, %v931_v24 }
 0x3bd   : > { %v946_v32 = vsel %vm595_vm1, %v2208_v28, 0.0 }
 0x3be   : > { %2209 = vpow2.f32 %v938_v31  ;;  %947 = vadd.xlane.f32.xlu1 %v946_v32 }
 0x3c0   : > { %1060 = vrot.lane.b32.xlu2 %v2459_v23, %s2285_s18 }
 0x3c4   : > { %v2210_v33 = vpop.eup %2209 }
 0x3c5   : > { %v949_v36 = vsel %vm595_vm1, %v2210_v33, 0.0 }
 0x3c6   : > { %950 = vadd.xlane.f32.xlu0 %v949_v36 }
 0x3c8   : > { %1242 = vrot.lane.b32.xlu2 %v2461_v26, %s2285_s18 }
 0x3d1   : > { %v1063_v37 = vpop.permute.xlu1 %1062 }
 0x3d2   : > { %v1068_v38 = vsel %vm595_vm1, %v1063_v37, 0 }
 0x3d3   : > { %1077 = vmatpush.bf16.xpose.msra.mxu0 %v1068_v38 }
 0x3d7   : > { %1129 = vrot.lane.b32.xlu1 %v2492_v4, %s2285_s18 }
 0x3da   : > { %1083 = vrot.lane.b32.xlu0 %v2453_v17, %s2285_s18 }
 0x3df   : > { %1221 = vrot.lane.b32.xlu1 %v2469_v30, %s2285_s18 }
 0x3e2   : > { %1200 = vrot.lane.b32.xlu0 %v2467_v29, %s2285_s18 }
 0x3e7   : > { %1286 = vrot.lane.b32.xlu1 %v2405_v25, %s2286_s20 }
 0x3ea   : > { %1263 = vrot.lane.b32.xlu0 %v2496_v6, %s2285_s18 }
 0x3f2   : > { %1309 = vrot.lane.b32.xlu0 %v2410_v35, %s2286_s20 }
 0x41b   : > { %v942_v39 = vpop.xlane.xlu2 %941 }
 0x41c   : > { %2211 = vrcp.f32 %v942_v39 }
 0x422   : > { %v2212_v41 = vpop.eup %2211 }
 0x423   : > { %v956_v42 = vmul.f32 %v2212_v41, %v2204_v11  ;;  %v945_v44 = vpop.xlane.xlu1 %944  ;;  %v1061_v25 = vpop.permute.xlu2 %1060 }
 0x424   : > { %2213 = vrcp.f32 %v945_v44 }
 0x425   : > { %v960_v45 = vpack.c.bf16 %v956_v42, %v956_v42 }
 0x427   : > { %2059 = vmatmul.msk.bf16.vlgmr.msrb.gmra.mxu0 %vm595_vm1, %v960_v45 }
 0x42a   : > { %v2214_v46 = vpop.eup %2213 }
 0x42b   : > { %v957_v47 = vmul.f32 %v2214_v46, %v2206_v15  ;;  %v1243_v55 = vpop.permute.xlu2 %1242 }
 0x42c   : > { %v1248_v57 = vsel %vm738_vm2, %v1243_v55, 0 }
 0x42d   : > { %v961_v43 = vpack.c.bf16 %v957_v47, %v957_v47 }
 0x42f   : > { %2060 = vmatmul.msk.bf16.vlgmr.msrb.gmra.mxu1 %vm595_vm1, %v961_v43 }
 0x431   : > { %v948_v51 = vpop.xlane.xlu1 %947 }
 0x432   : > { %2215 = vrcp.f32 %v948_v51 }
 0x437   : > { %2063 = vmatmul.msk.bf16.vlgmr.msra.gmra.mxu0 %vm595_vm1, %v1061_v25 }
 0x438   : > { %v2216_v35 = vpop.eup %2215 }
 0x439   : > { %v958_v52 = vmul.f32 %v2216_v35, %v2208_v28  ;;  %v951_v53 = vpop.xlane.xlu0 %950 }
 0x43a   : > { %2217 = vrcp.f32 %v951_v53 }
 0x43b   : > { %v962_v56 = vpack.c.bf16 %v958_v52, %v958_v52 }
 0x43d   : > { %2061 = vmatmul.msk.bf16.vlgmr.msra.gmra.mxu2 %vm595_vm1, %v962_v56 }
 0x43e   : > { %1257 = vmatpush.bf16.msra.mxu2 %v1248_v57 }
 0x440   : > { %v2218_v58 = vpop.eup %2217 }
 0x441   : > { %v959_v60 = vmul.f32 %v2218_v58, %v2210_v33 }
 0x443   : > { %v963_v61 = vpack.c.bf16 %v959_v60, %v959_v60 }
 0x445   : > { %2062 = vmatmul.msk.bf16.vlgmr.msrb.gmra.mxu3 %vm595_vm1, %v963_v61 }
 0x449   : > { %v1130_v62 = vpop.permute.xlu1 %1129 }
 0x44c   : > { %v1084_v63 = vpop.permute.xlu0 %1083 }
 0x44d   : > { %2064 = vmatmul.msk.bf16.vlgmr.msra.gmra.mxu1 %vm595_vm1, %v1084_v63  ;;  %2065 = vmatmul.msk.bf16.vlgmr.msrb.gmra.mxu2 %vm595_vm1, %v1107_v49 }
 0x451   : > { %v1222_v0 = vpop.permute.xlu1 %1221 }
 0x452   : > { %v1227_v2 = vsel %vm738_vm2, %v1222_v0, 0 }
 0x453   : > { %1236 = vmatpush.bf16.msrb.mxu1 %v1227_v2 }
 0x454   : > { %v1201_v3 = vpop.permute.xlu0 %1200 }
 0x455   : > { %v1206_v5 = vsel %vm738_vm2, %v1201_v3, 0  ;;  %2066 = vmatmul.msk.bf16.vlgmr.msra.gmra.mxu3 %vm595_vm1, %v1130_v62 }
 0x456   : > { %1215 = vmatpush.bf16.msrb.mxu0 %v1206_v5 }
 0x459   : > { %v1287_v7 = vpop.permute.xlu1 %1286 }
 0x45a   : > { %v1292_v8 = vsel %vm595_vm1, %v1287_v7, 0 }
 0x45b   : > { %1301 = vmatpush.bf16.xpose.msra.mxu0 %v1292_v8 }
 0x45c   : > { %v1264_v9 = vpop.permute.xlu0 %1263 }
 0x45d   : > { %v1269_v10 = vsel %vm738_vm2, %v1264_v9, 0 }
 0x45e   : > { %1278 = vmatpush.bf16.msrb.mxu3 %v1269_v10 }
 0x464   : > { %v1310_v1 = vpop.permute.xlu0 %1309 }
 0x465   : > { %v1315_v11 = vsel %vm595_vm1, %v1310_v1, 0 }
 0x466   : > { %1324 = vmatpush.bf16.xpose.msra.mxu1 %v1315_v11 }
 0x4a4   : > { %v2572_v12 = vpop.f32.mrf.mxu0 }
 0x4ac   : > { %v986_v13 = vpop.f32.mrf.mxu0  ;;  %v2574_v15 = vpop.f32.mrf.mxu1 }
 0x4ad   : > { %v2152_v16 = vpack.i.bf16 %v2574_v15, %v2572_v12 }
 0x4b4   : > { %v1010_v18 = vpop.f32.mrf.mxu1  ;;  %v1079_v19 = vpop.f32.mrf.mxu0 }
 0x4b5   : > { %v1152_v20 = vsel %vm595_vm1, %v1079_v19, -inf }
 0x4b6   : > { %1153 = vmax.xlane.f32.xlu1 %v1152_v20 }
 0x4bc   : > { %v1081_v21 = vpop.f32.mrf.mxu0 }
 0x4c0   : > { %v2579_v22 = vpop.f32.mrf.mxu2 }
 0x4c8   : > { %v1034_v24 = vpop.f32.mrf.mxu2  ;;  %v2581_v27 = vpop.f32.mrf.mxu3 }
 0x4c9   : > { %v2167_v28 = vpack.i.bf16 %v2581_v27, %v2579_v22 }
 0x4ca   : > { %v1102_v31 = vpop.f32.mrf.mxu1 }
 0x4cb   : > { %v1155_v32 = vsel %vm595_vm1, %v1102_v31, -inf }
 0x4cc   : > { %1156 = vmax.xlane.f32.xlu2 %v1155_v32 }
 0x4d0   : > { %v1058_v33 = vpop.f32.mrf.mxu3  ;;  %v1125_v36 = vpop.f32.mrf.mxu2 }
 0x4d1   : > { %v1158_v37 = vsel %vm595_vm1, %v1125_v36, -inf }
 0x4d2   : > { %v1104_v38 = vpop.f32.mrf.mxu1  ;;  %1159 = vmax.xlane.f32.xlu0 %v1158_v37 }
 0x4d8   : > { %v1127_v39 = vpop.f32.mrf.mxu2  ;;  %v1148_v41 = vpop.f32.mrf.mxu3 }
 0x4d9   : > { %v1161_v42 = vsel %vm595_vm1, %v1148_v41, -inf }
 0x4da   : > { %1162 = vmax.xlane.f32.xlu1 %v1161_v42 }
 0x4e0   : > { %v1150_v44 = vpop.f32.mrf.mxu3 }
 0x4e4   : > { %1332 = vrot.lane.b32.xlu2 %v2408_v34, %s2286_s20 }
 0x4e6   : > { %1284 = vrot.lane.b32.xlu0 %v2459_v23, %s2287_s21 }
 0x4f3   : > { %1355 = vrot.lane.b32.xlu1 %v2416_v40, %s2286_s20 }
 0x529   : > { %v1154_v45 = vpop.xlane.xlu1 %1153 }
 0x52a   : > { %v1164_v46 = vsub.f32 %v1079_v19, %v1154_v45 }
 0x52c   : > { %v1168_v47 = vmul.f32 1.442695, %v1164_v46 }
 0x52e   : > { %2219 = vpow2.f32 %v1168_v47 }
 0x534   : > { %v2220_v43 = vpop.eup %2219 }
 0x535   : > { %v1176_v25 = vsel %vm595_vm1, %v2220_v43, 0.0 }
 0x536   : > { %1177 = vadd.xlane.f32.xlu2 %v1176_v25 }
 0x53f   : > { %v1157_v49 = vpop.xlane.xlu2 %1156 }
 0x540   : > { %v1165_v51 = vsub.f32 %v1102_v31, %v1157_v49 }
 0x542   : > { %v1170_v35 = vmul.f32 1.442695, %v1165_v51 }
 0x544   : > { %2221 = vpow2.f32 %v1170_v35 }
 0x545   : > { %v1160_v34 = vpop.xlane.xlu0 %1159 }
 0x546   : > { %v1166_v52 = vsub.f32 %v1125_v36, %v1160_v34 }
 0x547   : > { %v1333_v53 = vpop.permute.xlu2 %1332 }
 0x548   : > { %v1172_v55 = vmul.f32 1.442695, %v1166_v52  ;;  %v1338_v23 = vsel %vm595_vm1, %v1333_v53, 0 }
 0x549   : > { %1347 = vmatpush.bf16.xpose.msrb.mxu2 %v1338_v23 }
 0x54a   : > { %v2222_v40 = vpop.eup %2221  ;;  %2223 = vpow2.f32 %v1172_v55 }
 0x54b   : > { %v1179_v56 = vsel %vm595_vm1, %v2222_v40, 0.0 }
 0x54c   : > { %1180 = vadd.xlane.f32.xlu0 %v1179_v56 }
 0x54d   : > { %v1163_v57 = vpop.xlane.xlu1 %1162 }
 0x54e   : > { %v1167_v58 = vsub.f32 %v1148_v41, %v1163_v57 }
 0x550   : > { %v2224_v60 = vpop.eup %2223  ;;  %v1174_v61 = vmul.f32 1.442695, %v1167_v58 }
 0x551   : > { %v1182_v62 = vsel %vm595_vm1, %v2224_v60, 0.0 }
 0x552   : > { %2225 = vpow2.f32 %v1174_v61  ;;  %1183 = vadd.xlane.f32.xlu1 %v1182_v62 }
 0x558   : > { %v2226_v63 = vpop.eup %2225  ;;  %v1285_v10 = vpop.permute.xlu0 %1284 }
 0x559   : > { %v1185_v0 = vsel %vm595_vm1, %v2226_v63, 0.0 }
 0x55a   : > { %1186 = vadd.xlane.f32.xlu2 %v1185_v0 }
 0x560   : > { %1353 = vrot.lane.b32.xlu0 %v2492_v4, %s2287_s21 }
 0x565   : > { %v1356_v2 = vpop.permute.xlu1 %1355 }
 0x566   : > { %v1361_v3 = vsel %vm595_vm1, %v1356_v2, 0 }
 0x567   : > { %1370 = vmatpush.bf16.xpose.msra.mxu3 %v1361_v3 }
 0x56b   : > { %1330 = vrot.lane.b32.xlu1 %v2447_v14, %s2287_s21 }
 0x572   : > { %1307 = vrot.lane.b32.xlu2 %v2453_v17, %s2287_s21 }
 0x5a9   : > { %v1178_v5 = vpop.xlane.xlu2 %1177 }
 0x5aa   : > { %2227 = vrcp.f32 %v1178_v5 }
 0x5b0   : > { %v2228_v7 = vpop.eup %2227 }
 0x5b1   : > { %v1192_v8 = vmul.f32 %v2228_v7, %v2220_v43 }
 0x5b3   : > { %v1196_v9 = vpack.c.bf16 %v1192_v8, %v1192_v8 }
 0x5b5   : > { %2067 = vmatmul.msk.bf16.vlgmr.msrb.gmra.mxu0 %vm595_vm1, %v1196_v9 }
 0x5bf   : > { %v1181_v1 = vpop.xlane.xlu0 %1180 }
 0x5c0   : > { %2229 = vrcp.f32 %v1181_v1 }
 0x5c5   : > { %v1184_v4 = vpop.xlane.xlu1 %1183  ;;  %2071 = vmatmul.msk.bf16.vlgmr.msra.gmra.mxu0 %vm595_vm1, %v1285_v10 }
 0x5c6   : > { %v2230_v11 = vpop.eup %2229  ;;  %2231 = vrcp.f32 %v1184_v4 }
 0x5c7   : > { %v1193_v13 = vmul.f32 %v2230_v11, %v2222_v40 }
 0x5c9   : > { %v1197_v14 = vpack.c.bf16 %v1193_v13, %v1193_v13 }
 0x5cb   : > { %2068 = vmatmul.msk.bf16.vlgmr.msrb.gmra.mxu1 %vm595_vm1, %v1197_v14 }
 0x5cc   : > { %v2232_v17 = vpop.eup %2231 }
 0x5cd   : > { %v1194_v18 = vmul.f32 %v2232_v17, %v2224_v60  ;;  %v1187_v19 = vpop.xlane.xlu2 %1186 }
 0x5ce   : > { %2233 = vrcp.f32 %v1187_v19 }
 0x5cf   : > { %v1198_v20 = vpack.c.bf16 %v1194_v18, %v1194_v18 }
 0x5d1   : > { %2069 = vmatmul.msk.bf16.vlgmr.msra.gmra.mxu2 %vm595_vm1, %v1198_v20 }
 0x5d2   : > { %v1354_v36 = vpop.permute.xlu0 %1353 }
 0x5d4   : > { %v2234_v21 = vpop.eup %2233 }
 0x5d5   : > { %v1195_v24 = vmul.f32 %v2234_v21, %v2226_v63  ;;  %v1308_v32 = vpop.permute.xlu2 %1307 }
 0x5d7   : > { %v1199_v31 = vpack.c.bf16 %v1195_v24, %v1195_v24 }
 0x5d9   : > { %2070 = vmatmul.msk.bf16.vlgmr.msrb.gmra.mxu3 %vm595_vm1, %v1199_v31 }
 0x5db   : > { %2072 = vmatmul.msk.bf16.vlgmr.msra.gmra.mxu1 %vm595_vm1, %v1308_v32 }
 0x5dd   : > { %v1331_v33 = vpop.permute.xlu1 %1330 }
 0x5e1   : > { %2073 = vmatmul.msk.bf16.vlgmr.msrb.gmra.mxu2 %vm595_vm1, %v1331_v33 }
 0x5e9   : > { %2074 = vmatmul.msk.bf16.vlgmr.msra.gmra.mxu3 %vm595_vm1, %v1354_v36 }
 0x632   : > { %v1217_v37 = vpop.f32.mrf.mxu0 }
 0x63a   : > { %v1219_v38 = vpop.f32.mrf.mxu0 }
 0x642   : > { %v1303_v39 = vpop.f32.mrf.mxu0 }
 0x643   : > { %v1376_v41 = vsel %vm595_vm1, %v1303_v39, -inf }
 0x644   : > { %1377 = vmax.xlane.f32.xlu2 %v1376_v41 }
 0x648   : > { %v1238_v42 = vpop.f32.mrf.mxu1 }
 0x649   : > { %v2157_v44 = vpack.i.bf16 %v1238_v42, %v1217_v37 }
 0x64a   : > { %v1305_v45 = vpop.f32.mrf.mxu0 }
 0x650   : > { %v1240_v46 = vpop.f32.mrf.mxu1 }
 0x654   : > { %v2615_v47 = vpop.f32.mrf.mxu2 }
 0x658   : > { %v1326_v43 = vpop.f32.mrf.mxu1 }
 0x659   : > { %v1379_v25 = vsel %vm595_vm1, %v1326_v43, -inf }
 0x65a   : > { %1380 = vmax.xlane.f32.xlu1 %v1379_v25 }
 0x65c   : > { %v1261_v49 = vpop.f32.mrf.mxu2  ;;  %v2618_v51 = vpop.f32.mrf.mxu3 }
 0x65d   : > { %v2172_v35 = vpack.i.bf16 %v2618_v51, %v2615_v47  ;;  %v2124_v49 = vld [vmem:[%s2805_s6 + $0x8] sm:$0xff] }
 0x660   : > { %v1328_v34 = vpop.f32.mrf.mxu1 }
 0x664   : > { %v1282_v52 = vpop.f32.mrf.mxu3  ;;  %v1349_v53 = vpop.f32.mrf.mxu2 }
 0x665   : > { %v1382_v55 = vsel %vm595_vm1, %v1349_v53, -inf }
 0x666   : > { %1383 = vmax.xlane.f32.xlu0 %v1382_v55 }
 0x66c   : > { %v1351_v23 = vpop.f32.mrf.mxu2  ;;  %v1372_v40 = vpop.f32.mrf.mxu3 }
 0x66d   : > { %v1385_v56 = vsel %vm595_vm1, %v1372_v40, -inf }
 0x66e   : > { %1386 = vmax.xlane.f32.xlu2 %v1385_v56  ;;  %v2123_v56 = vld [vmem:[%s2805_s6] sm:$0xff] }
 0x674   : > { %v1374_v57 = vpop.f32.mrf.mxu3 }
 0x67a   : > { %1424 = vrot.lane.b32.xlu0 %v2467_v29, %s2287_s21 }
 0x682   : > { %1466 = vrot.lane.b32.xlu0 %v2461_v26, %s2287_s21 }
 0x68a   : > { %2153 = vrot.lane.b32.xlu0 %v2152_v16, %s2288_s23 }
 0x6b7   : > { %v1378_v58 = vpop.xlane.xlu2 %1377 }
 0x6b8   : > { %v1388_v60 = vsub.f32 %v1303_v39, %v1378_v58 }
 0x6ba   : > { %v1392_v61 = vmul.f32 1.442695, %v1388_v60 }
 0x6bc   : > { %2235 = vpow2.f32 %v1392_v61 }
 0x6c2   : > { %v2236_v62 = vpop.eup %2235 }
 0x6c3   : > { %v1400_v63 = vsel %vm595_vm1, %v2236_v62, 0.0 }
 0x6c4   : > { %1401 = vadd.xlane.f32.xlu1 %v1400_v63 }
 0x6cd   : > { %v1381_v0 = vpop.xlane.xlu1 %1380 }
 0x6ce   : > { %v1389_v2 = vsub.f32 %v1326_v43, %v1381_v0 }
 0x6d0   : > { %v1394_v29 = vmul.f32 1.442695, %v1389_v2 }
 0x6d2   : > { %2237 = vpow2.f32 %v1394_v29 }
 0x6d8   : > { %v2238_v3 = vpop.eup %2237 }
 0x6d9   : > { %v1384_v26 = vpop.xlane.xlu0 %1383  ;;  %v1403_v5 = vsel %vm595_vm1, %v2238_v3, 0.0 }
 0x6da   : > { %v1390_v7 = vsub.f32 %v1349_v53, %v1384_v26  ;;  %1404 = vadd.xlane.f32.xlu2 %v1403_v5 }
 0x6dc   : > { %v1396_v12 = vmul.f32 1.442695, %v1390_v7 }
 0x6dd   : > { %1445 = vrot.lane.b32.xlu1 %v2469_v30, %s2287_s21 }
 0x6de   : > { %2239 = vpow2.f32 %v1396_v12 }
 0x6e1   : > { %v1387_v15 = vpop.xlane.xlu2 %1386 }
 0x6e2   : > { %v1391_v16 = vsub.f32 %v1372_v40, %v1387_v15 }
 0x6e4   : > { %v2240_v8 = vpop.eup %2239  ;;  %v1398_v9 = vmul.f32 1.442695, %v1391_v16 }
 0x6e5   : > { %2158 = vrot.lane.b32.xlu1 %v2157_v44, %s2289_s24  ;;  %v1406_v10 = vsel %vm595_vm1, %v2240_v8, 0.0 }
 0x6e6   : > { %2241 = vpow2.f32 %v1398_v9  ;;  %1407 = vadd.xlane.f32.xlu2 %v1406_v10 }
 0x6ec   : > { %v2242_v1 = vpop.eup %2241  ;;  %v1425_v4 = vpop.permute.xlu0 %1424 }
 0x6ed   : > { %v1430_v11 = vsel %vm738_vm2, %v1425_v4, 0  ;;  %2168 = vrot.lane.b32.xlu1 %v2167_v28, %s2288_s23  ;;  %v1409_v30 = vsel %vm595_vm1, %v2242_v1, 0.0 }
 0x6ee   : > { %1410 = vadd.xlane.f32.xlu2 %v1409_v30  ;;  %1439 = vmatpush.bf16.msrb.mxu0 %v1430_v11 }
 0x6f2   : > { %1604 = vmatpush.bf16.msra.mxu0 %v2124_v49 }
 0x6f4   : > { %v1467_v13 = vpop.permute.xlu0 %1466 }
 0x6f5   : > { %v1472_v14 = vsel %vm738_vm2, %v1467_v13, 0 }
 0x6f6   : > { %1481 = vmatpush.bf16.msra.mxu2 %v1472_v14  ;;  %1605 = vmatpush.bf16.msra.mxu0 %v2123_v56 }
 0x6fc   : > { %v2154_v57 = vpop.permute.xlu0 %2153 }
 0x6fd   : > { %v2156_v60 = vunpack.i.h.bf16 %v2154_v57  ;;  %v2155_v61 = vunpack.i.l.bf16 %v2154_v57 }
 0x6ff   : > { %v1557_v51 = vsel %vm595_vm1, %v2518_v50, %v2156_v60 }
 0x706   : > { %1487 = vrot.lane.b32.xlu2 %v2496_v6, %s2287_s21  ;;  %s2784_s21 = scalar_lea.vmem %s2812_s13, %s2382_s19 }
 0x737   : > { %v1402_v17 = vpop.xlane.xlu1 %1401 }
 0x738   : > { %2243 = vrcp.f32 %v1402_v17 }
 0x73e   : > { %v2244_v18 = vpop.eup %2243 }
 0x73f   : > { %v1416_v19 = vmul.f32 %v2244_v18, %v2236_v62 }
 0x741   : > { %v1420_v20 = vpack.c.bf16 %v1416_v19, %v1416_v19 }
 0x743   : > { %2075 = vmatmul.msk.bf16.vlgmr.msrb.gmra.mxu0 %vm595_vm1, %v1420_v20  ;;  %v2269_v20 = vld [vmem:[%s2388_s22] sm:$0xff] }
 0x74d   : > { %v1405_v22 = vpop.xlane.xlu2 %1404 }
 0x74e   : > { %2245 = vrcp.f32 %v1405_v22 }
 0x74f   : > { %v1446_v27 = vpop.permute.xlu1 %1445 }
 0x750   : > { %v1451_v28 = vsel %vm738_vm2, %v1446_v27, 0 }
 0x751   : > { %1460 = vmatpush.bf16.msrb.mxu1 %v1451_v28 }
 0x754   : > { %v2246_v21 = vpop.eup %2245 }
 0x755   : > { %v1417_v24 = vmul.f32 %v2246_v21, %v2238_v3 }
 0x757   : > { %v1421_v31 = vpack.c.bf16 %v1417_v24, %v1417_v24  ;;  %v2159_v58 = vpop.permute.xlu1 %2158  ;;  %v2270_v24 = vld [vmem:[%s2388_s22 + $0x8] sm:$0xff] }
 0x758   : > { %v2161_v62 = vunpack.i.h.bf16 %v2159_v58  ;;  %v2160_v63 = vunpack.i.l.bf16 %v2159_v58 }
 0x759   : > { %2076 = vmatmul.msk.bf16.vlgmr.msrb.gmra.mxu1 %vm595_vm1, %v1421_v31  ;;  %v1408_v32 = vpop.xlane.xlu2 %1407 }
 0x75a   : > { %2247 = vrcp.f32 %v1408_v32  ;;  %v1562_v3 = vsel %vm1560_vm3, %v1557_v51, %v2161_v62 }
 0x75f   : > { %v2169_v12 = vpop.permute.xlu1 %2168 }
 0x760   : > { %v2248_v6 = vpop.eup %2247  ;;  %v2171_v16 = vunpack.i.h.bf16 %v2169_v12  ;;  %v2170_v50 = vunpack.i.l.bf16 %v2169_v12  ;;  %v2126_v12 = vld [vmem:[%s2807_s8 + $0x8] sm:$0xff] }
 0x761   : > { %v1418_v33 = vmul.f32 %v2248_v6, %v2240_v8  ;;  %v1411_v36 = vpop.xlane.xlu2 %1410  ;;  %1761 = vmatpush.bf16.msra.mxu1 %v2126_v12 }
 0x762   : > { %2249 = vrcp.f32 %v1411_v36  ;;  %v1559_v10 = vsel %vm595_vm1, %v2524_v59, %v2171_v16  ;;  %v2184_v59 = vld [vmem:[%s2806_s7] ss:$0 sm:$0xff]  ;;  %v2271_v36 = vld [vmem:[%s2388_s22 + $0x10] sm:$0xff] }
 0x763   : > { %v1422_v37 = vpack.c.bf16 %v1418_v33, %v1418_v33 }
 0x765   : > { %2077 = vmatmul.msk.bf16.vlgmr.msra.gmra.mxu2 %vm595_vm1, %v1422_v37 }
 0x768   : > { %v2250_v38 = vpop.eup %2249 }
 0x769   : > { %v1419_v39 = vmul.f32 %v2250_v38, %v2242_v1  ;;  %v1488_v41 = vpop.permute.xlu2 %1487  ;;  %v1558_v1 = vsel %vm595_vm1, %v2521_v54, %v2170_v50 }
 0x76a   : > { %v1493_v42 = vsel %vm738_vm2, %v1488_v41, 0 }
 0x76b   : > { %v1423_v44 = vpack.c.bf16 %v1419_v39, %v1419_v39  ;;  %1502 = vmatpush.bf16.msrb.mxu3 %v1493_v42  ;;  %v2272_v42 = vld [vmem:[%s2388_s22 + $0x18] sm:$0xff] }
 0x76e   : > { %2078 = vmatmul.msk.bf16.vlgmr.msrb.gmra.mxu3 %vm595_vm1, %v1423_v44 }
 0x7c0   : > { %v1441_v45 = vpop.f32.mrf.mxu0 }
 0x7c8   : > { %v1443_v46 = vpop.f32.mrf.mxu0 }
 0x7c9   : > { %v2291_v46 = vmov 32.0  }
 0x7ca   : > { %2251 = vrcp.f32 %v2291_v46 }
 0x7d6   : > { %v1462_v43 = vpop.f32.mrf.mxu1 }
 0x7d7   : > { %v2162_v25 = vpack.i.bf16 %v1462_v43, %v1441_v45  ;;  %v2252_v43 = vpop.eup %2251 }
 0x7d8   : > { %vm1639_vm5 = vweird.f32 %v2252_v43 }
 0x7d9   : > { %2163 = vrot.lane.b32.xlu0 %v2162_v25, %s2290_s26  ;;  %v1635_v25 = vmul.f32 32.0, %v2252_v43 }
 0x7db   : > { %v1636_v49 = vsub.f32 1.0, %v1635_v25 }
 0x7de   : > { %v1464_v34 = vpop.f32.mrf.mxu1 }
 0x7df   : > { %v1637_v34 = vmul.f32 %v2252_v43, %v1636_v49 }
 0x7e1   : > { %2173 = vrot.lane.b32.xlu0 %v2172_v35, %s2289_s24  ;;  %v1556_v35 = vsel %vm595_vm1, %v2516_v48, %v2155_v61 }
 0x7e2   : > { %v1561_v29 = vsel %vm1560_vm3, %v1556_v35, %v2160_v63 }
 0x7e8   : > { %v1483_v52 = vpop.f32.mrf.mxu2 }
 0x7f0   : > { %v1485_v53 = vpop.f32.mrf.mxu2 }
 0x7f1   : > { %v1504_v55 = vpop.f32.mrf.mxu3 }
 0x7f2   : > { %v2177_v23 = vpack.i.bf16 %v1504_v55, %v1483_v52  ;;  %v1638_v52 = vadd.f32 %v2252_v43, %v1637_v34 }
 0x7f4   : > { %2178 = vrot.lane.b32.xlu2 %v2177_v23, %s2290_s26  ;;  %v2692_v53 = vsel %vm1639_vm5, %v2252_v43, %v1638_v52 }
 0x7f9   : > { %v1506_v40 = vpop.f32.mrf.mxu3 }
 0x84b   : > { %v2164_v47 = vpop.permute.xlu0 %2163 }
 0x84c   : > { %v2166_v0 = vunpack.i.h.bf16 %v2164_v47  ;;  %v2165_v2 = vunpack.i.l.bf16 %v2164_v47 }
 0x84e   : > { %v1566_v26 = vsel %vm1565_vm4, %v1561_v29, %v2165_v2  ;;  %v1567_v5 = vsel %vm1565_vm4, %v1562_v3, %v2166_v0  ;;  %v2179_v9 = vpop.permute.xlu2 %2178 }
 0x84f   : > { %v1570_v7 = vpack.c.bf16 %v1567_v5, %v1566_v26  ;;  %v2181_v30 = vunpack.i.h.bf16 %v2179_v9  ;;  %v2180_v13 = vunpack.i.l.bf16 %v2179_v9 }
 0x851   : > { %2087 = vmatmul.msk.bf16.vlgmr.msra.gmra.mxu0 %vm501_vm0, %v1570_v7 }
 0x853   : > { %v2174_v15 = vpop.permute.xlu0 %2173 }
 0x854   : > { %v2176_v8 = vunpack.i.h.bf16 %v2174_v15  ;;  %v2175_v48 = vunpack.i.l.bf16 %v2174_v15 }
 0x856   : > { %v1564_v4 = vsel %vm1560_vm3, %v1559_v10, %v2176_v8  ;;  %v1563_v11 = vsel %vm1560_vm3, %v1558_v1, %v2175_v48  ;;  %v2125_v8 = vld [vmem:[%s2807_s8] sm:$0xff]  ;;  %vm1816_vm3 = vcmask 523264  }
 0x857   : > { %v1568_v14 = vsel %vm1565_vm4, %v1563_v11, %v2180_v13  ;;  %v1569_v17 = vsel %vm1565_vm4, %v1564_v4, %v2181_v30  ;;  %1762 = vmatpush.bf16.msra.mxu1 %v2125_v8 }
 0x858   : > { %v1571_v18 = vpack.c.bf16 %v1569_v17, %v1568_v14 }
 0x861   : > { %2088 = vmatmul.msk.bf16.gmra.mxu0 %vm501_vm0, %v1571_v18 }
 0x8ce   : > { %v1607_v54 = vpop.f32.mrf.mxu0 }
 0x8cf   : > { %v1608_v19 = vadd.f32 %v2184_v59, %v1607_v54 }
 0x8d1   : > { %v1618_v22 = vadd.f32 %v2269_v20, %v1608_v19 }
 0x8d3   : > { %v1622_v27 = vsel %vm501_vm0, %v1618_v22, 0.0 }
 0x8d4   : > { %1623 = vadd.xlane.f32.xlu1 %v1622_v27 }
 0x8d6   : > { %v1609_v28 = vpop.f32.mrf.mxu0 }
 0x8d7   : > { %v1610_v21 = vadd.f32 %v2184_v59, %v1609_v28 }
 0x8d9   : > { %v1619_v31 = vadd.f32 %v2270_v24, %v1610_v21 }
 0x8db   : > { %v1625_v32 = vsel %vm501_vm0, %v1619_v31, 0.0 }
 0x8dc   : > { %1626 = vadd.xlane.f32.xlu0 %v1625_v32 }
 0x8de   : > { %v1612_v6 = vpop.f32.mrf.mxu0 }
 0x8df   : > { %v1613_v33 = vadd.f32 %v2184_v59, %v1612_v6 }
 0x8e1   : > { %v1620_v37 = vadd.f32 %v2271_v36, %v1613_v33 }
 0x8e3   : > { %v1628_v38 = vsel %vm501_vm0, %v1620_v37, 0.0 }
 0x8e4   : > { %1629 = vadd.xlane.f32.xlu2 %v1628_v38 }
 0x8e6   : > { %v1614_v39 = vpop.f32.mrf.mxu0 }
 0x8e7   : > { %v1615_v41 = vadd.f32 %v2184_v59, %v1614_v39 }
 0x8e9   : > { %v1621_v44 = vadd.f32 %v2272_v42, %v1615_v41 }
 0x8eb   : > { %v1631_v45 = vsel %vm501_vm0, %v1621_v44, 0.0 }
 0x8ec   : > { %1632 = vadd.xlane.f32.xlu1 %v1631_v45 }
 0x947   : > { %v1624_v55 = vpop.xlane.xlu1 %1623 }
 0x948   : > { %v1641_v23 = vmul.f32 %v2692_v53, %v1624_v55 }
 0x94a   : > { %v1645_v40 = vsub.f32 %v1618_v22, %v1641_v23  ;;  %v2726_v22 = vld [vmem:[%s2811_s12] sm:$0xf] }
 0x94b   : > { %v1717_v6 = vperm.slane %v2726_v22, 0  ;;  %v1722_v42 = vperm.slane %v2726_v22, 1 }
 0x94c   : > { %v1649_v56 = vmul.f32 %v1645_v40, %v1645_v40 }
 0x94e   : > { %v1653_v57 = vsel %vm501_vm0, %v1649_v56, 0.0 }
 0x94f   : > { %v1627_v58 = vpop.xlane.xlu0 %1626  ;;  %1654 = vadd.xlane.f32.xlu0 %v1653_v57 }
 0x950   : > { %v1642_v60 = vmul.f32 %v2692_v53, %v1627_v58 }
 0x952   : > { %v2697_v61 = vsub.f32 %v1619_v31, %v1642_v60 }
 0x954   : > { %v1650_v62 = vmul.f32 %v2697_v61, %v2697_v61 }
 0x956   : > { %v1656_v63 = vsel %vm501_vm0, %v1650_v62, 0.0 }
 0x957   : > { %1657 = vadd.xlane.f32.xlu2 %v1656_v63  ;;  %v1630_v47 = vpop.xlane.xlu2 %1629 }
 0x958   : > { %v1643_v51 = vmul.f32 %v2692_v53, %v1630_v47 }
 0x95a   : > { %v2703_v35 = vsub.f32 %v1620_v37, %v1643_v51 }
 0x95c   : > { %v1651_v0 = vmul.f32 %v2703_v35, %v2703_v35 }
 0x95e   : > { %v1659_v2 = vsel %vm501_vm0, %v1651_v0, 0.0 }
 0x95f   : > { %v1633_v29 = vpop.xlane.xlu1 %1632  ;;  %1660 = vadd.xlane.f32.xlu1 %v1659_v2 }
 0x960   : > { %v1644_v3 = vmul.f32 %v2692_v53, %v1633_v29 }
 0x962   : > { %v2709_v26 = vsub.f32 %v1621_v44, %v1644_v3 }
 0x964   : > { %v1652_v5 = vmul.f32 %v2709_v26, %v2709_v26 }
 0x966   : > { %v1662_v7 = vsel %vm501_vm0, %v1652_v5, 0.0  ;;  %v2130_v5 = vld [vmem:[%s2809_s10 + $0x18] sm:$0xff] }
 0x967   : > { %1663 = vadd.xlane.f32.xlu0 %v1662_v7  ;;  %1827 = vmatpush.bf16.msrb.mxu2 %v2130_v5  ;;  %v2127_v7 = vld [vmem:[%s2809_s10] sm:$0xff] }
 0x9c2   : > { %v1655_v15 = vpop.xlane.xlu0 %1654 }
 0x9c3   : > { %v1665_v16 = vmul.f32 %v1655_v15, %v2692_v53  ;;  %v2185_v15 = vld [vmem:[%s2808_s9] ss:$0 sm:$0xff] }
 0x9c5   : > { %v1669_v50 = vadd.f32 1e-05, %v1665_v16 }
 0x9c7   : > { %2253 = vrsqrt.f32 %v1669_v50  ;;  %vm1679_vm7 = vweird.f32 %v1669_v50 }
 0x9ca   : > { %v1658_v48 = vpop.xlane.xlu2 %1657 }
 0x9cb   : > { %v1666_v9 = vmul.f32 %v1658_v48, %v2692_v53 }
 0x9cd   : > { %v2254_v10 = vpop.eup %2253  ;;  %v1670_v1 = vadd.f32 1e-05, %v1666_v9 }
 0x9ce   : > { %v1674_v4 = vmul.f32 %v2254_v10, %v1669_v50  ;;  %vm1680_vm6 = vweird.f32 %v2254_v10 }
 0x9cf   : > { %2255 = vrsqrt.f32 %v1670_v1  ;;  %vm1681_vm8 = vmor %vm1679_vm7, %vm1680_vm6  ;;  %vm1689_vm10 = vweird.f32 %v1670_v1 }
 0x9d0   : > { %v1675_v11 = vmul.f32 %v2254_v10, %v1674_v4 }
 0x9d2   : > { %v1676_v30 = vmul.f32 0.5, %v1675_v11  ;;  %v1661_v13 = vpop.xlane.xlu1 %1660 }
 0x9d3   : > { %v1667_v14 = vmul.f32 %v1661_v13, %v2692_v53 }
 0x9d4   : > { %v1677_v17 = vsub.f32 1.5, %v1676_v30 }
 0x9d5   : > { %v2256_v18 = vpop.eup %2255  ;;  %v1671_v59 = vadd.f32 1e-05, %v1667_v14 }
 0x9d6   : > { %v1678_v54 = vmul.f32 %v2254_v10, %v1677_v17  ;;  %v1684_v19 = vmul.f32 %v2256_v18, %v1670_v1  ;;  %vm1690_vm9 = vweird.f32 %v2256_v18 }
 0x9d7   : > { %2257 = vrsqrt.f32 %v1671_v59  ;;  %vm1691_vm11 = vmor %vm1689_vm10, %vm1690_vm9  ;;  %vm1699_vm13 = vweird.f32 %v1671_v59 }
 0x9d8   : > { %v1685_v20 = vmul.f32 %v2256_v18, %v1684_v19  ;;  %v1682_v27 = vsel %vm1681_vm8, %v2254_v10, %v1678_v54 }
 0x9d9   : > { %v1713_v33 = vmul.f32 %v1682_v27, %v1645_v40 }
 0x9da   : > { %v1686_v28 = vmul.f32 0.5, %v1685_v20  ;;  %v1664_v21 = vpop.xlane.xlu0 %1663 }
 0x9db   : > { %v1668_v24 = vmul.f32 %v1664_v21, %v2692_v53  ;;  %v1718_v44 = vmul.f32 %v1717_v6, %v1713_v33 }
 0x9dc   : > { %v1687_v31 = vsub.f32 1.5, %v1686_v28 }
 0x9dd   : > { %v2258_v32 = vpop.eup %2257  ;;  %v1672_v36 = vadd.f32 1e-05, %v1668_v24  ;;  %v1723_v34 = vadd.f32 %v1722_v42, %v1718_v44 }
 0x9de   : > { %v1688_v37 = vmul.f32 %v2256_v18, %v1687_v31  ;;  %v1694_v38 = vmul.f32 %v2258_v32, %v1671_v59  ;;  %vm1700_vm12 = vweird.f32 %v2258_v32 }
 0x9df   : > { %2259 = vrsqrt.f32 %v1672_v36  ;;  %vm1701_vm14 = vmor %vm1699_vm13, %vm1700_vm12  ;;  %vm1709_vm1 = vweird.f32 %v1672_v36 }
 0x9e0   : > { %v1692_v39 = vsel %vm1691_vm11, %v2256_v18, %v1688_v37  ;;  %v1695_v41 = vmul.f32 %v2258_v32, %v1694_v38  ;;  %v2186_v18 = vld [vmem:[%s2810_s11] ss:$0 sm:$0xff] }
 0x9e1   : > { %v1714_v45 = vmul.f32 %v1692_v39, %v2697_v61 }
 0x9e2   : > { %v1696_v46 = vmul.f32 0.5, %v1695_v41 }
 0x9e3   : > { %v1719_v43 = vmul.f32 %v1717_v6, %v1714_v45 }
 0x9e4   : > { %v1697_v25 = vsub.f32 1.5, %v1696_v46 }
 0x9e5   : > { %v2260_v49 = vpop.eup %2259  ;;  %v1724_v52 = vadd.f32 %v1722_v42, %v1719_v43 }
 0x9e6   : > { %v1698_v55 = vmul.f32 %v2258_v32, %v1697_v25  ;;  %v1704_v23 = vmul.f32 %v2260_v49, %v1672_v36  ;;  %vm1710_vm15 = vweird.f32 %v2260_v49 }
 0x9e7   : > { %v1727_v40 = vpack.c.bf16 %v1724_v52, %v1723_v34  ;;  %vm1711_vm2 = vmor %vm1709_vm1, %vm1710_vm15 }
 0x9e8   : > { %v1705_v56 = vmul.f32 %v2260_v49, %v1704_v23  ;;  %v1702_v57 = vsel %vm1701_vm14, %v2258_v32, %v1698_v55 }
 0x9e9   : > { %2097 = vmatmul.msk.bf16.vlgmr.msra.gmra.mxu1 %vm501_vm0, %v1727_v40  ;;  %v1715_v61 = vmul.f32 %v1702_v57, %v2703_v35  ;;  %v2129_v35 = vld [vmem:[%s2809_s10 + $0x10] sm:$0xff] }
 0x9ea   : > { %v1706_v58 = vmul.f32 0.5, %v1705_v56  ;;  %1828 = vmatpush.bf16.msrb.mxu2 %v2129_v35 }
 0x9eb   : > { %v1720_v51 = vmul.f32 %v1717_v6, %v1715_v61 }
 0x9ec   : > { %v1707_v60 = vsub.f32 1.5, %v1706_v58 }
 0x9ed   : > { %v1725_v2 = vadd.f32 %v1722_v42, %v1720_v51 }
 0x9ee   : > { %v1708_v62 = vmul.f32 %v2260_v49, %v1707_v60 }
 0x9f0   : > { %v1712_v63 = vsel %vm1711_vm2, %v2260_v49, %v1708_v62 }
 0x9f1   : > { %v1716_v47 = vmul.f32 %v1712_v63, %v2709_v26  ;;  %v2128_v26 = vld [vmem:[%s2809_s10 + $0x8] sm:$0xff] }
 0x9f2   : > { %1829 = vmatpush.bf16.msrb.mxu2 %v2128_v26 }
 0x9f3   : > { %v1721_v0 = vmul.f32 %v1717_v6, %v1716_v47 }
 0x9f5   : > { %v1726_v29 = vadd.f32 %v1722_v42, %v1721_v0 }
 0x9f6   : > { %1830 = vmatpush.bf16.msrb.mxu2 %v2127_v7 }
 0x9f7   : > { %v1728_v3 = vpack.c.bf16 %v1726_v29, %v1725_v2 }
 0x9f9   : > { %2098 = vmatmul.msk.bf16.gmra.mxu1 %vm501_vm0, %v1728_v3 }
 0xa66   : > { %v1764_v12 = vpop.f32.mrf.mxu1 }
 0xa67   : > { %v1765_v16 = vadd.f32 %v2185_v15, %v1764_v12 }
 0xa69   : > { %v1774_v48 = vmax.f32 %v1765_v16, 0.0 }
 0xa6e   : > { %v1766_v50 = vpop.f32.mrf.mxu1 }
 0xa6f   : > { %v1767_v8 = vadd.f32 %v2185_v15, %v1766_v50 }
 0xa71   : > { %v1775_v9 = vmax.f32 %v1767_v8, 0.0 }
 0xa73   : > { %v1778_v10 = vpack.c.bf16 %v1775_v9, %v1774_v48 }
 0xa75   : > { %2115 = vmatmul.msk.bf16.vlgmr.msrb.gmra.mxu2 %vm1816_vm3, %v1778_v10  ;;  %v1934_v10 = vperm.slane %v2726_v22, 2 }
 0xa76   : > { %v1769_v1 = vpop.f32.mrf.mxu1 }
 0xa77   : > { %v1770_v4 = vadd.f32 %v2185_v15, %v1769_v1 }
 0xa79   : > { %v1776_v13 = vmax.f32 %v1770_v4, 0.0 }
 0xa7e   : > { %v1771_v11 = vpop.f32.mrf.mxu1 }
 0xa7f   : > { %v1772_v30 = vadd.f32 %v2185_v15, %v1771_v11  ;;  %v1939_v11 = vperm.slane %v2726_v22, 3 }
 0xa81   : > { %v1777_v14 = vmax.f32 %v1772_v30, 0.0 }
 0xa83   : > { %v1779_v17 = vpack.c.bf16 %v1777_v14, %v1776_v13 }
 0xa85   : > { %2116 = vmatmul.msk.bf16.gmra.mxu2 %vm1816_vm3, %v1779_v17 }
 0xaf8   : > { %v1832_v59 = vpop.f32.mrf.mxu2 }
 0xaf9   : > { %v1833_v54 = vadd.f32 %v2186_v18, %v1832_v59 }
 0xafb   : > { %v1842_v19 = vadd.f32 %v1833_v54, %v1723_v34 }
 0xafd   : > { %v1846_v20 = vsel %vm501_vm0, %v1842_v19, 0.0 }
 0xafe   : > { %1847 = vadd.xlane.f32.xlu2 %v1846_v20 }
 0xb00   : > { %v1834_v27 = vpop.f32.mrf.mxu2 }
 0xb01   : > { %v1835_v28 = vadd.f32 %v2186_v18, %v1834_v27 }
 0xb03   : > { %v1843_v21 = vadd.f32 %v1835_v28, %v1724_v52 }
 0xb05   : > { %v1849_v24 = vsel %vm501_vm0, %v1843_v21, 0.0 }
 0xb06   : > { %1850 = vadd.xlane.f32.xlu1 %v1849_v24 }
 0xb08   : > { %v1837_v31 = vpop.f32.mrf.mxu2 }
 0xb09   : > { %v1838_v32 = vadd.f32 %v2186_v18, %v1837_v31 }
 0xb0b   : > { %v1844_v6 = vadd.f32 %v1838_v32, %v1725_v2 }
 0xb0d   : > { %v1852_v33 = vsel %vm501_vm0, %v1844_v6, 0.0 }
 0xb0e   : > { %1853 = vadd.xlane.f32.xlu0 %v1852_v33 }
 0xb10   : > { %v1839_v36 = vpop.f32.mrf.mxu2 }
 0xb11   : > { %v1840_v37 = vadd.f32 %v2186_v18, %v1839_v36 }
 0xb13   : > { %v1845_v38 = vadd.f32 %v1840_v37, %v1726_v29 }
 0xb15   : > { %v1855_v39 = vsel %vm501_vm0, %v1845_v38, 0.0 }
 0xb16   : > { %1856 = vadd.xlane.f32.xlu2 %v1855_v39 }
 0xb71   : > { %v1848_v41 = vpop.xlane.xlu2 %1847 }
 0xb72   : > { %v1858_v42 = vmul.f32 %v1848_v41, %v2692_v53 }
 0xb74   : > { %v1862_v44 = vsub.f32 %v1842_v19, %v1858_v42 }
 0xb76   : > { %v1866_v45 = vmul.f32 %v1862_v44, %v1862_v44 }
 0xb78   : > { %v1870_v46 = vsel %vm501_vm0, %v1866_v45, 0.0 }
 0xb79   : > { %v1851_v43 = vpop.xlane.xlu1 %1850  ;;  %1871 = vadd.xlane.f32.xlu1 %v1870_v46 }
 0xb7a   : > { %v1859_v25 = vmul.f32 %v1851_v43, %v2692_v53 }
 0xb7c   : > { %v1863_v49 = vsub.f32 %v1843_v21, %v1859_v25 }
 0xb7e   : > { %v1867_v34 = vmul.f32 %v1863_v49, %v1863_v49 }
 0xb80   : > { %v1873_v52 = vsel %vm501_vm0, %v1867_v34, 0.0 }
 0xb81   : > { %v1854_v55 = vpop.xlane.xlu0 %1853  ;;  %1874 = vadd.xlane.f32.xlu0 %v1873_v52 }
 0xb82   : > { %v1860_v23 = vmul.f32 %v1854_v55, %v2692_v53 }
 0xb84   : > { %v2763_v40 = vsub.f32 %v1844_v6, %v1860_v23 }
 0xb86   : > { %v1868_v56 = vmul.f32 %v2763_v40, %v2763_v40 }
 0xb88   : > { %v1876_v57 = vsel %vm501_vm0, %v1868_v56, 0.0 }
 0xb89   : > { %1877 = vadd.xlane.f32.xlu2 %v1876_v57  ;;  %v1857_v58 = vpop.xlane.xlu2 %1856 }
 0xb8a   : > { %v1861_v60 = vmul.f32 %v1857_v58, %v2692_v53 }
 0xb8c   : > { %v2769_v61 = vsub.f32 %v1845_v38, %v1861_v60 }
 0xb8e   : > { %v1869_v62 = vmul.f32 %v2769_v61, %v2769_v61 }
 0xb90   : > { %v1879_v63 = vsel %vm501_vm0, %v1869_v62, 0.0 }
 0xb91   : > { %1880 = vadd.xlane.f32.xlu1 %v1879_v63 }
 0xbec   : > { %v1872_v47 = vpop.xlane.xlu1 %1871 }
 0xbed   : > { %v1882_v51 = vmul.f32 %v1872_v47, %v2692_v53 }
 0xbef   : > { %v1886_v0 = vadd.f32 1e-05, %v1882_v51 }
 0xbf1   : > { %2261 = vrsqrt.f32 %v1886_v0  ;;  %vm1896_vm5 = vweird.f32 %v1886_v0 }
 0xbf4   : > { %v1875_v2 = vpop.xlane.xlu0 %1874 }
 0xbf5   : > { %v1883_v29 = vmul.f32 %v1875_v2, %v2692_v53 }
 0xbf7   : > { %v2262_v3 = vpop.eup %2261  ;;  %v1887_v5 = vadd.f32 1e-05, %v1883_v29 }
 0xbf8   : > { %v1891_v35 = vmul.f32 %v2262_v3, %v1886_v0  ;;  %vm1897_vm4 = vweird.f32 %v2262_v3 }
 0xbf9   : > { %2263 = vrsqrt.f32 %v1887_v5  ;;  %vm1898_vm6 = vmor %vm1896_vm5, %vm1897_vm4  ;;  %vm1906_vm8 = vweird.f32 %v1887_v5 }
 0xbfa   : > { %v1892_v26 = vmul.f32 %v2262_v3, %v1891_v35 }
 0xbfc   : > { %v1893_v7 = vmul.f32 0.5, %v1892_v26  ;;  %v1878_v12 = vpop.xlane.xlu2 %1877 }
 0xbfd   : > { %v1884_v15 = vmul.f32 %v1878_v12, %v2692_v53 }
 0xbfe   : > { %v1894_v16 = vsub.f32 1.5, %v1893_v7 }
 0xbff   : > { %v2264_v50 = vpop.eup %2263  ;;  %v1888_v8 = vadd.f32 1e-05, %v1884_v15 }
 0xc00   : > { %v1895_v48 = vmul.f32 %v2262_v3, %v1894_v16  ;;  %v1901_v9 = vmul.f32 %v2264_v50, %v1887_v5  ;;  %vm1907_vm7 = vweird.f32 %v2264_v50 }
 0xc01   : > { %2265 = vrsqrt.f32 %v1888_v8  ;;  %vm1908_vm9 = vmor %vm1906_vm8, %vm1907_vm7  ;;  %vm1916_vm11 = vweird.f32 %v1888_v8 }
 0xc02   : > { %v1899_v1 = vsel %vm1898_vm6, %v2262_v3, %v1895_v48  ;;  %v1902_v4 = vmul.f32 %v2264_v50, %v1901_v9 }
 0xc03   : > { %v1930_v30 = vmul.f32 %v1899_v1, %v1862_v44 }
 0xc04   : > { %v1903_v13 = vmul.f32 0.5, %v1902_v4  ;;  %v1881_v14 = vpop.xlane.xlu1 %1880 }
 0xc05   : > { %v1935_v17 = vmul.f32 %v1934_v10, %v1930_v30  ;;  %v1885_v18 = vmul.f32 %v1881_v14, %v2692_v53 }
 0xc06   : > { %v1904_v59 = vsub.f32 1.5, %v1903_v13 }
 0xc07   : > { %v2266_v54 = vpop.eup %2265  ;;  %v1940_v19 = vadd.f32 %v1939_v11, %v1935_v17  ;;  %v1889_v20 = vadd.f32 1e-05, %v1885_v18 }
 0xc08   : > { %v1905_v27 = vmul.f32 %v2264_v50, %v1904_v59  ;;  %v1911_v22 = vmul.f32 %v2266_v54, %v1888_v8  ;;  %vm1917_vm10 = vweird.f32 %v2266_v54 }
 0xc09   : > { %1944 = vst.msk [vmem:[%s2784_s21] sm:$0xff] %vm501_vm0, %v1940_v19  ;;  %2267 = vrsqrt.f32 %v1889_v20  ;;  %vm1918_vm12 = vmor %vm1916_vm11, %vm1917_vm10  ;;  %vm1926_vm14 = vweird.f32 %v1889_v20 }
 0xc0a   : > { %v1909_v53 = vsel %vm1908_vm9, %v2264_v50, %v1905_v27  ;;  %v1912_v28 = vmul.f32 %v2266_v54, %v1911_v22 }
 0xc0b   : > { %v1931_v21 = vmul.f32 %v1909_v53, %v1863_v49 }
 0xc0c   : > { %v1913_v24 = vmul.f32 0.5, %v1912_v28 }
 0xc0d   : > { %v1936_v31 = vmul.f32 %v1934_v10, %v1931_v21 }
 0xc0e   : > { %v1914_v32 = vsub.f32 1.5, %v1913_v24 }
 0xc0f   : > { %v2268_v6 = vpop.eup %2267  ;;  %v1941_v33 = vadd.f32 %v1939_v11, %v1936_v31 }
 0xc10   : > { %v1915_v36 = vmul.f32 %v2266_v54, %v1914_v32  ;;  %v1921_v37 = vmul.f32 %v2268_v6, %v1889_v20  ;;  %vm1927_vm13 = vweird.f32 %v2268_v6 }
 0xc11   : > { %1945 = vst.msk [vmem:[%s2784_s21 + $0x8] sm:$0xff] %vm501_vm0, %v1941_v33  ;;  %vm1928_vm15 = vmor %vm1926_vm14, %vm1927_vm13 }
 0xc12   : > { %v1919_v38 = vsel %vm1918_vm12, %v2266_v54, %v1915_v36  ;;  %v1922_v39 = vmul.f32 %v2268_v6, %v1921_v37 }
 0xc13   : > { %v1932_v41 = vmul.f32 %v1919_v38, %v2763_v40 }
 0xc14   : > { %v1923_v42 = vmul.f32 0.5, %v1922_v39 }
 0xc15   : > { %v1937_v44 = vmul.f32 %v1934_v10, %v1932_v41 }
 0xc16   : > { %v1924_v45 = vsub.f32 1.5, %v1923_v42 }
 0xc17   : > { %v1942_v46 = vadd.f32 %v1939_v11, %v1937_v44 }
 0xc18   : > { %v1925_v43 = vmul.f32 %v2268_v6, %v1924_v45 }
 0xc19   : > { %1946 = vst.msk [vmem:[%s2784_s21 + $0x10] sm:$0xff] %vm501_vm0, %v1942_v46 }
 0xc1a   : > { %v1929_v25 = vsel %vm1928_vm15, %v2268_v6, %v1925_v43 }
 0xc1b   : > { %v1933_v49 = vmul.f32 %v1929_v25, %v2769_v61 }
 0xc1d   : > { %v1938_v34 = vmul.f32 %v1934_v10, %v1933_v49 }
 0xc1f   : > { %v1943_v52 = vadd.f32 %v1939_v11, %v1938_v34 }
 0xc21   : > { %1947 = vst.msk [vmem:[%s2784_s21 + $0x18] sm:$0xff] %vm501_vm0, %v1943_v52 }
 0xc22 PF: > { %s23_s25 = sadd.s32 1, %s2279_s25  }
 0xc23   : > { %p20_p4 = scmp.ge.s32.totalorder %s23_s25, 4  }
 0xc25   :  { %22 = sbr.rel (!%p20_p4) target bundleno = 1 (0x1), region = 105 }

</bundles_post_ra>
